<compile_context>
chip_gen: v7x
topology: tpu7x:2x2x1
jax: 0.10.0
libtpu: 0.0.40
codegen_flags: <defaults>
</compile_context>

<pallas_src>
import jax
import jax.numpy as jnp
from jax.experimental import pallas as pl
from jax.experimental.pallas import tpu as pltpu


def _round_up(a, b):
    return ((a + b - 1) // b) * b


def _vmem_capacity_bytes():
    try:
        return int(pltpu.get_tpu_info().vmem_capacity_bytes)
    except Exception:
        return 64 * 1024 * 1024  # conservative (v7x per-TC)


def _image_da_kernel(x_ref, w1_ref, w2_ref, o_ref):
    # x_ref : (1, C, thw)       input tile (one image, all channels, spatial tile)
    # w1_ref: (hidden, C)       Conv1 weight (1x1 conv == matmul over channels), bf16
    # w2_ref: (n_out, hidden)   Conv2 weight, bf16
    # o_ref : (1, n_out, thw)   f32 output tile (lane-dense last dim)
    x = x_ref[0].astype(w1_ref.dtype)                 # no-op when input is already bf16
    h = jnp.dot(w1_ref[...], x, preferred_element_type=jnp.float32)   # (hidden, thw) f32
    # ReLU fused with the downcast: only one (hidden, thw) intermediate stays live.
    h = jnp.maximum(h, 0.0).astype(w2_ref.dtype)
    o_ref[0] = jnp.dot(w2_ref[...], h,
                       preferred_element_type=jnp.float32).astype(o_ref.dtype)


def image_da_forward(x, need_backprop, conv1_w, conv2_w, *,
                     tile_hw_max=None, compute_dtype=jnp.bfloat16):
    """Forward pass of _ImageDA.

    Args:
      x            : (N, C, H, W) float32 or bfloat16 -- NCHW, like the PyTorch module.
                     Passing bf16 (cast fused into the backbone producer) halves the
                     dominant HBM read; compute is bf16 MXU with f32 accumulation either way.
      need_backprop: (N,)           float  -- per-image domain label.
      conv1_w      : (512, C, 1, 1) float32 -- Conv1.weight (no bias).
      conv2_w      : (2, 512, 1, 1) float32 -- Conv2.weight (no bias).

    Returns:
      (out, label) with out: (N, 2, H, W) float32, label: (N, H, W) int32.
      NOTE: label is int32 (PyTorch returns int64); bf16 MXU compute diverges from
      PyTorch's f32 conv by ~1e-3 relative, which is fine for DA logits.
    """
    N, C, H, W = x.shape
    hidden = conv1_w.shape[0]          # 512
    n_out = conv2_w.shape[0]           # 2
    HW = H * W

    # grad_reverse is the identity in the forward pass.
    # TODO(synk): attach a custom_vjp (grad scale -0.1) if this is used under jax.grad.

    vmem_cap = _vmem_capacity_bytes()
    big_vmem = vmem_cap >= 96 * 1024 * 1024           # v5e/v6e: 128 MiB; v7x: 64 MiB
    if tile_hw_max is None:
        tile_hw_max = 2048 if big_vmem else 1024

    # NCHW consumed directly; spatial axis flattened to the lane dimension.
    # No padding pass: the last spatial block may be partial (Pallas masks it).
    x3 = x.reshape(N, C, HW)
    tile_hw = min(tile_hw_max, _round_up(HW, 128))

    # Megacore (v7x has 2 TCs): with N == 1 make sure the grid has >= 2 spatial
    # steps; the extra grid step costs ~0.35 us on single-TC chips, negligible.
    if N == 1 and tile_hw >= HW and HW > 256:
        tile_hw = max(128, _round_up(-(-HW // 2), 128))

    n_tiles = pl.cdiv(HW, tile_hw)
    grid = (N, n_tiles)

    # Weights are tiny and reused across all grid steps -> cast once in wrapper.
    # NOTE: for very small C (e.g. the test's C=4) the first matmul underfills the
    # MXU; real da_faster_rcnn dims (512/1024) are already well shaped.
    w1 = conv1_w.reshape(hidden, C).astype(compute_dtype)
    w2 = conv2_w.reshape(n_out, hidden).astype(compute_dtype)

    # Advisory cost estimate (true, unpadded traffic) for the XLA scheduler.
    x_bytes = x3.size * x3.dtype.itemsize
    w_bytes = w1.size * w1.dtype.itemsize + w2.size * w2.dtype.itemsize
    out_bytes = N * n_out * HW * 4
    flops = 2 * N * HW * (hidden * C + n_out * hidden)

    # VMEM budget: double-buffered input/output tiles, single-buffered resident
    # weights, bf16 input copy, one live (hidden, tile) intermediate (+f32 transient).
    isz = x3.dtype.itemsize
    wsz = jnp.dtype(compute_dtype).itemsize
    vmem_est = (2 * C * tile_hw * isz
                + hidden * C * wsz
                + n_out * hidden * wsz
                + C * tile_hw * wsz
                + hidden * tile_hw * (4 + wsz)
                + 2 * n_out * tile_hw * 4)
    cap = (96 * 1024 * 1024) if big_vmem else min(48 * 1024 * 1024,
                                                  int(0.75 * vmem_cap))
    vmem_limit = int(min(max(2 * vmem_est, 32 * 1024 * 1024), cap))

    def _build(single_buffer_weights):
        w_kw = {"pipeline_mode": pl.Buffered(1)} if single_buffer_weights else {}
        return pl.pallas_call(
            _image_da_kernel,
            out_shape=jax.ShapeDtypeStruct((N, n_out, HW), jnp.float32),
            grid_spec=pltpu.PrefetchScalarGridSpec(
                num_scalar_prefetch=0,
                grid=grid,
                in_specs=[
                    pl.BlockSpec((1, C, tile_hw), lambda n, j: (n, 0, j)),
                    pl.BlockSpec((hidden, C), lambda n, j: (0, 0), **w_kw),
                    pl.BlockSpec((n_out, hidden), lambda n, j: (0, 0), **w_kw),
                ],
                out_specs=pl.BlockSpec((1, n_out, tile_hw), lambda n, j: (n, 0, j)),
            ),
            compiler_params=pltpu.CompilerParams(
                dimension_semantics=("parallel", "parallel"),
                vmem_limit_bytes=vmem_limit),
            cost_estimate=pl.CostEstimate(
                flops=flops, transcendentals=0,
                bytes_accessed=x_bytes + w_bytes + out_bytes),
        )

    try:
        out3 = _build(True)(x3, w1, w2)
    except Exception:
        # pl.Buffered(1) not accepted by this jax version -> default double-buffering.
        out3 = _build(False)(x3, w1, w2)

    # No spatial padding to drop; restore NCHW (no transpose needed).
    out = out3.reshape(N, n_out, H, W)

    # ImageLabelResizeLayer: nearest-resize of one scalar label per image to the
    # feature-map spatial size == broadcast; torch returns .long(), we use int32.
    label = jnp.broadcast_to(
        need_backprop.astype(jnp.int32)[:, None, None], (N, H, W))

    return out, label


def _reference_forward(x, need_backprop, conv1_w, conv2_w,
                       compute_dtype=jnp.bfloat16):
    """Pure-JAX reference (no Pallas), same bf16 compute / f32 accumulation."""
    N, C, H, W = x.shape
    w1 = conv1_w.reshape(conv1_w.shape[0], C).astype(compute_dtype)
    w2 = conv2_w.reshape(conv2_w.shape[0], -1).astype(compute_dtype)
    xc = x.astype(compute_dtype)
    h = jnp.einsum('nchw,oc->nohw', xc, w1,
                   preferred_element_type=jnp.float32)
    h = jnp.maximum(h, 0.0)
    out = jnp.einsum('nchw,oc->nohw', h.astype(compute_dtype), w2,
                     preferred_element_type=jnp.float32)
    label = jnp.broadcast_to(
        need_backprop.astype(jnp.int32)[:, None, None], (N, H, W))
    return out, label


if __name__ == "__main__":
    key = jax.random.PRNGKey(0)
    k_x, k_w1, k_w2 = jax.random.split(key, 3)

    N, C, H, W = 2, 4, 16, 16      # small synthetic shapes; dim = C = 4
    hidden, n_out = 512, 2

    x = jax.random.normal(k_x, (N, C, H, W), dtype=jnp.float32)
    need_backprop = jnp.array([0.0, 1.0], dtype=jnp.float32)
    conv1_w = 0.01 * jax.random.normal(k_w1, (hidden, C, 1, 1), dtype=jnp.float32)
    conv2_w = 0.01 * jax.random.normal(k_w2, (n_out, hidden, 1, 1), dtype=jnp.float32)

    out, label = image_da_forward(x, need_backprop, conv1_w, conv2_w)
    jax.block_until_ready(out)
    jax.block_until_ready(label)

    ref_out, ref_label = _reference_forward(x, need_backprop, conv1_w, conv2_w)
    assert out.shape == (N, n_out, H, W)
    assert label.shape == (N, H, W)
    assert jnp.allclose(out, ref_out, atol=1e-4, rtol=1e-3), \
        float(jnp.max(jnp.abs(out - ref_out)))
    assert jnp.array_equal(label, ref_label)

    # Check 2: spatial size NOT a multiple of 128 (exercises the partial edge block).
    N2, H2, W2 = 1, 15, 17
    x2 = jax.random.normal(jax.random.PRNGKey(1), (N2, C, H2, W2), dtype=jnp.float32)
    nb2 = jnp.array([1.0], dtype=jnp.float32)
    out2, lbl2 = image_da_forward(x2, nb2, conv1_w, conv2_w)
    jax.block_until_ready(out2)
    ref_out2, ref_lbl2 = _reference_forward(x2, nb2, conv1_w, conv2_w)
    assert out2.shape == (N2, n_out, H2, W2)
    assert jnp.allclose(out2, ref_out2, atol=1e-4, rtol=1e-3), \
        float(jnp.max(jnp.abs(out2 - ref_out2)))
    assert jnp.array_equal(lbl2, ref_lbl2)

    # Check 3: bf16 input (the fast path: halved HBM read) + multi-tile partial edge.
    N3, H3, W3 = 2, 33, 40          # HW = 1320, not a multiple of the tile
    x3_in = jax.random.normal(jax.random.PRNGKey(2), (N3, C, H3, W3),
                              dtype=jnp.float32).astype(jnp.bfloat16)
    nb3 = jnp.array([1.0, 0.0], dtype=jnp.float32)
    out3, lbl3 = image_da_forward(x3_in, nb3, conv1_w, conv2_w)
    jax.block_until_ready(out3)
    ref_out3, ref_lbl3 = _reference_forward(x3_in, nb3, conv1_w, conv2_w)
    assert out3.shape == (N3, n_out, H3, W3)
    assert jnp.allclose(out3, ref_out3, atol=1e-4, rtol=1e-3), \
        float(jnp.max(jnp.abs(out3 - ref_out3)))
    assert jnp.array_equal(lbl3, ref_lbl3)

    print("KERNEL_OK")
</pallas_src>

<mosaic_0001>
module attributes {stable_mosaic.version = 11 : i64} {
  func.func @_image_da_kernel(%arg0: i32, %arg1: i32, %arg2: memref<1x4x256xf32, #tpu.memory_space<vmem>>, %arg3: memref<512x4xbf16, #tpu.memory_space<vmem>>, %arg4: memref<2x512xbf16, #tpu.memory_space<vmem>>, %arg5: memref<1x2x256xf32, #tpu.memory_space<vmem>>) attributes {dimension_semantics = [#tpu.dimension_semantics<parallel>, #tpu.dimension_semantics<parallel>], iteration_bounds = array<i64: 2, 1>, scalar_prefetch = 0 : i64, scratch_operands = 0 : i64, tpu.core_type = #tpu.core_type<tc>, window_params = [{transform_indices = @transform_0, window_bounds = array<i64: 1, 4, 256>}, {pipeline_mode = #tpu.pipeline_mode<synchronous>, transform_indices = @transform_1, window_bounds = array<i64: 512, 4>}, {pipeline_mode = #tpu.pipeline_mode<synchronous>, transform_indices = @transform_2, window_bounds = array<i64: 2, 512>}, {transform_indices = @transform_3, window_bounds = array<i64: 1, 2, 256>}]} {
    %c0 = arith.constant 0 : index
    %c0_0 = arith.constant 0 : index
    %c0_1 = arith.constant 0 : index
    %0 = vector.load %arg2[%c0, %c0_0, %c0_1] : memref<1x4x256xf32, #tpu.memory_space<vmem>>, vector<1x4x256xf32>
    %1 = vector.shape_cast %0 : vector<1x4x256xf32> to vector<4x256xf32>
    %2 = arith.truncf %1 : vector<4x256xf32> to vector<4x256xbf16>
    %c0_2 = arith.constant 0 : index
    %c0_3 = arith.constant 0 : index
    %3 = vector.load %arg3[%c0_2, %c0_3] : memref<512x4xbf16, #tpu.memory_space<vmem>>, vector<512x4xbf16>
    %cst = arith.constant dense<0.000000e+00> : vector<512x256xf32>
    %4 = tpu.matmul %3, %2, %cst {dimension_numbers = #tpu.dot_dimension_numbers<[1], [0], [0], [1], [0, 0, 1, 1], [], []>} : vector<512x4xbf16>, vector<4x256xbf16>, vector<512x256xf32> -> vector<512x256xf32>
    %cst_4 = arith.constant 0.000000e+00 : f32
    %5 = vector.broadcast %cst_4 : f32 to vector<512x256xf32>
    %6 = arith.maximumf %4, %5 : vector<512x256xf32>
    %7 = arith.truncf %6 : vector<512x256xf32> to vector<512x256xbf16>
    %c0_5 = arith.constant 0 : index
    %c0_6 = arith.constant 0 : index
    %8 = vector.load %arg4[%c0_5, %c0_6] : memref<2x512xbf16, #tpu.memory_space<vmem>>, vector<2x512xbf16>
    %cst_7 = arith.constant dense<0.000000e+00> : vector<2x256xf32>
    %9 = tpu.matmul %8, %7, %cst_7 {dimension_numbers = #tpu.dot_dimension_numbers<[1], [0], [0], [1], [0, 0, 1, 1], [], []>} : vector<2x512xbf16>, vector<512x256xbf16>, vector<2x256xf32> -> vector<2x256xf32>
    %c0_8 = arith.constant 0 : index
    %c0_9 = arith.constant 0 : index
    %c0_10 = arith.constant 0 : index
    %10 = vector.load %arg5[%c0_8, %c0_9, %c0_10] : memref<1x2x256xf32, #tpu.memory_space<vmem>>, vector<1x2x256xf32>
    %11 = vector.shape_cast %10 : vector<1x2x256xf32> to vector<2x256xf32>
    %12 = vector.shape_cast %9 : vector<2x256xf32> to vector<1x2x256xf32>
    tpu.vector_store %arg5[%c0_8, %c0_9, %c0_10], %12 {strides = array<i32>} : memref<1x2x256xf32, #tpu.memory_space<vmem>>, vector<1x2x256xf32>,
    return
  }
  func.func @transform_0(%arg0: i32, %arg1: i32) -> (i32, i32, i32) {
    %c0_i32 = arith.constant 0 : i32
    %c0_i32_0 = arith.constant 0 : i32
    return %arg0, %c0_i32, %arg1 : i32, i32, i32
  }
  func.func @transform_1(%arg0: i32, %arg1: i32) -> (i32, i32) {
    %c0_i32 = arith.constant 0 : i32
    %c0_i32_0 = arith.constant 0 : i32
    %c0_i32_1 = arith.constant 0 : i32
    return %c0_i32, %c0_i32_0 : i32, i32
  }
  func.func @transform_2(%arg0: i32, %arg1: i32) -> (i32, i32) {
    %c0_i32 = arith.constant 0 : i32
    %c0_i32_0 = arith.constant 0 : i32
    %c0_i32_1 = arith.constant 0 : i32
    return %c0_i32, %c0_i32_0 : i32, i32
  }
  func.func @transform_3(%arg0: i32, %arg1: i32) -> (i32, i32, i32) {
    %c0_i32 = arith.constant 0 : i32
    %c0_i32_0 = arith.constant 0 : i32
    return %arg0, %c0_i32, %arg1 : i32, i32, i32
  }
}

module attributes {stable_mosaic.version = 11 : i64} {
  func.func @_image_da_kernel(%arg0: i32, %arg1: i32, %arg2: memref<1x4x256xf32, #tpu.memory_space<vmem>>, %arg3: memref<512x4xbf16, #tpu.memory_space<vmem>>, %arg4: memref<2x512xbf16, #tpu.memory_space<vmem>>, %arg5: memref<1x2x256xf32, #tpu.memory_space<vmem>>) attributes {dimension_semantics = [#tpu.dimension_semantics<parallel>, #tpu.dimension_semantics<parallel>], iteration_bounds = array<i64: 2, 1>, scalar_prefetch = 0 : i64, scratch_operands = 0 : i64, tpu.core_type = #tpu.core_type<tc>, window_params = [{transform_indices = @transform_0, window_bounds = array<i64: 1, 4, 256>}, {pipeline_mode = #tpu.pipeline_mode<synchronous>, transform_indices = @transform_1, window_bounds = array<i64: 512, 4>}, {pipeline_mode = #tpu.pipeline_mode<synchronous>, transform_indices = @transform_2, window_bounds = array<i64: 2, 512>}, {transform_indices = @transform_3, window_bounds = array<i64: 1, 2, 256>}]} {
    %c0 = arith.constant 0 : index
    %c0_0 = arith.constant 0 : index
    %c0_1 = arith.constant 0 : index
    %0 = vector.load %arg2[%c0, %c0_0, %c0_1] : memref<1x4x256xf32, #tpu.memory_space<vmem>>, vector<1x4x256xf32>
    %1 = vector.shape_cast %0 : vector<1x4x256xf32> to vector<4x256xf32>
    %2 = arith.truncf %1 : vector<4x256xf32> to vector<4x256xbf16>
    %c0_2 = arith.constant 0 : index
    %c0_3 = arith.constant 0 : index
    %3 = vector.load %arg3[%c0_2, %c0_3] : memref<512x4xbf16, #tpu.memory_space<vmem>>, vector<512x4xbf16>
    %cst = arith.constant dense<0.000000e+00> : vector<512x256xf32>
    %4 = tpu.matmul %3, %2, %cst {dimension_numbers = #tpu.dot_dimension_numbers<[1], [0], [0], [1], [0, 0, 1, 1], [], []>} : vector<512x4xbf16>, vector<4x256xbf16>, vector<512x256xf32> -> vector<512x256xf32>
    %cst_4 = arith.constant 0.000000e+00 : f32
    %5 = vector.broadcast %cst_4 : f32 to vector<512x256xf32>
    %6 = arith.maximumf %4, %5 : vector<512x256xf32>
    %7 = arith.truncf %6 : vector<512x256xf32> to vector<512x256xbf16>
    %c0_5 = arith.constant 0 : index
    %c0_6 = arith.constant 0 : index
    %8 = vector.load %arg4[%c0_5, %c0_6] : memref<2x512xbf16, #tpu.memory_space<vmem>>, vector<2x512xbf16>
    %cst_7 = arith.constant dense<0.000000e+00> : vector<2x256xf32>
    %9 = tpu.matmul %8, %7, %cst_7 {dimension_numbers = #tpu.dot_dimension_numbers<[1], [0], [0], [1], [0, 0, 1, 1], [], []>} : vector<2x512xbf16>, vector<512x256xbf16>, vector<2x256xf32> -> vector<2x256xf32>
    %c0_8 = arith.constant 0 : index
    %c0_9 = arith.constant 0 : index
    %c0_10 = arith.constant 0 : index
    %10 = vector.load %arg5[%c0_8, %c0_9, %c0_10] : memref<1x2x256xf32, #tpu.memory_space<vmem>>, vector<1x2x256xf32>
    %11 = vector.shape_cast %10 : vector<1x2x256xf32> to vector<2x256xf32>
    %12 = vector.shape_cast %9 : vector<2x256xf32> to vector<1x2x256xf32>
    tpu.vector_store %arg5[%c0_8, %c0_9, %c0_10], %12 {strides = array<i32>} : memref<1x2x256xf32, #tpu.memory_space<vmem>>, vector<1x2x256xf32>,
    return
  }
  func.func @transform_0(%arg0: i32, %arg1: i32) -> (i32, i32, i32) {
    %c0_i32 = arith.constant 0 : i32
    %c0_i32_0 = arith.constant 0 : i32
    return %arg0, %c0_i32, %arg1 : i32, i32, i32
  }
  func.func @transform_1(%arg0: i32, %arg1: i32) -> (i32, i32) {
    %c0_i32 = arith.constant 0 : i32
    %c0_i32_0 = arith.constant 0 : i32
    %c0_i32_1 = arith.constant 0 : i32
    return %c0_i32, %c0_i32_0 : i32, i32
  }
  func.func @transform_2(%arg0: i32, %arg1: i32) -> (i32, i32) {
    %c0_i32 = arith.constant 0 : i32
    %c0_i32_0 = arith.constant 0 : i32
    %c0_i32_1 = arith.constant 0 : i32
    return %c0_i32, %c0_i32_0 : i32, i32
  }
  func.func @transform_3(%arg0: i32, %arg1: i32) -> (i32, i32, i32) {
    %c0_i32 = arith.constant 0 : i32
    %c0_i32_0 = arith.constant 0 : i32
    return %arg0, %c0_i32, %arg1 : i32, i32, i32
  }
}

</mosaic_0001>

<bundles_post_ra>
// kernel: tpu_custom_call.1
= control target key start
LH: loop header
LB: loop body
LE: loop exit
PB: predicated region body
PF: predicated region fallthrough
CT: control target
= control target key end

     0   :  { %8 = vsyncpa [#allocation3], 0  ;;  %s1929_s0 = inlined_call_operand.vmem [shape: f32[2,4,256], index: 0, kind: input, shape index: {}]   ;;  %s1930_s1 = inlined_call_operand.vmem [shape: bf16[512,4], index: 1, kind: input, shape index: {}]   ;;  %s1931_s2 = inlined_call_operand.vmem [shape: bf16[2,512], index: 2, kind: input, shape index: {}]   ;;  %s1932_s3 = inlined_call_operand.hbm [shape: f32[2,2,256], index: 3, kind: output, shape index: {}]  }
   0x1   :  { %10 = vsyncpa [#allocation3 + $0x1], 0  ;;  %s1578_s12 = smov 0   ;;  %s1580_s13 = smov 0  }
   0x2   :  { %s1582_s14 = smov 0   ;;  %s1584_s15 = smov 0  }
   0x3   :  { %s1586_s16 = smov 0   ;;  %s1588_s17 = smov 0  }
   0x4 LB: > { %s1297_s18 = sadd.s32 4294967295, %s1553_s17   ;;  %s1298_s19 = sadd.s32 4294967294, %s1553_s17   ;;  %s1553_s17 = sphi %s1588_s17, %s16_s17   ;;  %s1549_s16 = sphi %s1586_s16, %s1939_s16   ;;  %s1545_s15 = sphi %s1584_s15, %s1938_s15   ;;  %s1541_s14 = sphi %s1582_s14, %s1937_s14   ;;  %s1537_s13 = sphi %s1580_s13, %s1936_s13   ;;  %s1533_s12 = sphi %s1578_s12, %s1935_s12  }
   0x5   : > { %s28_s20 = sadd.s32 1, %s1549_s16  ;;  %s107_s21 = sadd.s32 1, %s1541_s14 }
   0x6   : > { %p30_p0 = scmp.ge.s32.totalorder %s28_s20, 2  ;;  %p117_p1 = scmp.ne.s32.totalorder %s1541_s14, %s1537_s13 }
   0x7   : > { %p118_p2 = scmp.eq.s32.totalorder %s1297_s18, 1  ;;  %p123_p3 = scmp.ne.s32.totalorder %s1537_s13, %s1533_s12 }
   0x8   : > { %s1941_s20 = smov (%p30_p0, %s28_s20), 0  ;;  %p124_p5 = scmp.eq.s32.totalorder %s1298_s19, 1 }
   0x9   : > { %p1618_p4 = por %p118_p2, %p117_p1  ;;  %s102_s23 = ssub.s32 %s1549_s16, %s1941_s20 }
   0xa   : > { %p1301_p6 = scmp.ge.s32.totalorder %s1553_s17, 1  ;;  %p105_p7 = scmp.eq.s32.totalorder %s102_s23, 0 }
   0xb   : > { %p1625_p8 = por %p124_p5, %p123_p3  ;;  %p161_p9 = scmp.lt.s32.totalorder %s1553_s17, 3 }
   0xc   : > { %s1631_s25 = scalar_select %p105_p7, %s1541_s14, %s107_s21  }
   0xd   : > { %p162_p10 = pnand %p1301_p6, %p161_p9 }
   0xe   : > { %p190_p11 = scmp.lt.s32.totalorder (!%p162_p10), %s1545_s15, 1  ;;  %v1555_v0 = vmov (!%p162_p10), 0   ;;  %vm528_vm0 = vcmask (!%p162_p10), 1041408   ;;  %v1443_v6 = vld [vmem:[%s1930_s1] sm:$0xff] (!%p162_p10)   ;;  %vm431_vm1 = vcmask (!%p162_p10), 31744   ;;  %v1459_v7 = vld [vmem:[%s1930_s1 + $0xa8] sm:$0xff] (!%p162_p10)   ;;  %v1093_v41 = vlaneseq (!%p162_p10) }
   0xf   : > { %165 = sbr.rel (%p162_p10) target bundleno = 691 (0x2b3), region = 32  ;;  %567 = vmatprep.mubr.bf16.mxu0 (!%p162_p10), %v1555_v0  ;;  %777 = vmatprep.mubr.bf16.mxu1 (!%p162_p10), %v1555_v0  ;;  %v1444_v8 = vld [vmem:[%s1930_s1 + $0x8] sm:$0xff] (!%p162_p10)   ;;  %v1461_v9 = vld [vmem:[%s1930_s1 + $0xb0] sm:$0xff] (!%p162_p10)   ;;  %v1463_v11 = vld [vmem:[%s1930_s1 + $0xb8] sm:$0xff] (!%p162_p10)   ;;  %v1556_v39 = vmov (!%p162_p10), 1966171168  }
  0x10   : > { %v1445_v10 = vld [vmem:[%s1930_s1 + $0x10] sm:$0xff] (!%p162_p10)   ;;  %v1446_v12 = vld [vmem:[%s1930_s1 + $0x18] sm:$0xff] (!%p162_p10)   ;;  %v1465_v13 = vld [vmem:[%s1930_s1 + $0xc0] sm:$0xff] (!%p162_p10)   ;;  %v1091_v40 = vunpack.c.l.s4 (!%p162_p10), %v1556_v39  ;;  %v1094_v46 = vshrl.u32 (!%p162_p10), %v1093_v41, 7  ;;  %s186_s29 = sand.u32 (!%p162_p10), 1, %s1537_s13   ;;  %s1378_s4 = sshll.u32 (!%p162_p10), %s1545_s15, 6 }
  0x11   : > { %v1447_v14 = vld [vmem:[%s1930_s1 + $0x20] sm:$0xff] (!%p162_p10)   ;;  %v1467_v15 = vld [vmem:[%s1930_s1 + $0xc8] sm:$0xff] (!%p162_p10)   ;;  %v1469_v17 = vld [vmem:[%s1930_s1 + $0xd0] sm:$0xff] (!%p162_p10)   ;;  %s1882_s9 = scalar_lea.hbm (!%p162_p10), %s1932_s3, %s1378_s4  ;;  %s1205_s10 = scalar_lea.sflag (!%p162_p10), [#allocation3], %s186_s29 }
  0x12   : > { %v1448_v16 = vld [vmem:[%s1930_s1 + $0x28] sm:$0xff] (!%p162_p10)   ;;  %v1449_v18 = vld [vmem:[%s1930_s1 + $0x30] sm:$0xff] (!%p162_p10)   ;;  %v1470_v19 = vld [vmem:[%s1930_s1 + $0xd8] sm:$0xff] (!%p162_p10)   ;;  %v1092_v45 = vunpack.c.0.s8 (!%p162_p10), %v1091_v40  ;;  %s1557_s11 = smov (!%p162_p10), [#allocation2]  }
  0x13   : > { %v1450_v20 = vld [vmem:[%s1930_s1 + $0x38] sm:$0xff] (!%p162_p10)   ;;  %v1471_v21 = vld [vmem:[%s1930_s1 + $0xe0] sm:$0xff] (!%p162_p10)   ;;  %v1472_v23 = vld [vmem:[%s1930_s1 + $0xe8] sm:$0xff] (!%p162_p10)   ;;  %s1479_s18 = sshll.u32 (!%p162_p10), %s1557_s11, 4  ;;  %s1480_s18 = int_to_ptr.vmem [resolvable:$false] %s1479_s18 }
  0x14   : > { %v1451_v22 = vld [vmem:[%s1930_s1 + $0x40] sm:$0xff] (!%p162_p10)   ;;  %v1452_v24 = vld [vmem:[%s1930_s1 + $0x48] sm:$0xff] (!%p162_p10)   ;;  %v1473_v25 = vld [vmem:[%s1930_s1 + $0xf0] sm:$0xff] (!%p162_p10)   ;;  %v1095_v54 = vsub.s32 (!%p162_p10), %v1092_v45, %v1094_v46  ;;  %s1481_s19 = scalar_lea.vmem (!%p162_p10), %s1480_s18, 128 }
  0x15   : > { %v1453_v26 = vld [vmem:[%s1930_s1 + $0x50] sm:$0xff] (!%p162_p10)   ;;  %v1474_v27 = vld [vmem:[%s1930_s1 + $0xf8] sm:$0xff] (!%p162_p10)   ;;  %v1455_v29 = vld [vmem:[%s1930_s1 + $0x60] sm:$0xff] (!%p162_p10)  }
  0x16   : > { %s191_s26 = scalar_select %p190_p11, %s1545_s15, 1  ;;  %v1454_v28 = vld [vmem:[%s1930_s1 + $0x58] sm:$0xff]   ;;  %v1456_v30 = vld [vmem:[%s1930_s1 + $0x68] sm:$0xff]   ;;  %v1457_v31 = vld [vmem:[%s1930_s1 + $0x70] sm:$0xff]  }
  0x17   : > { %v1458_v32 = vld [vmem:[%s1930_s1 + $0x78] sm:$0xff]   ;;  %v1460_v33 = vld [vmem:[%s1930_s1 + $0x80] sm:$0xff]   ;;  %v1462_v34 = vld [vmem:[%s1930_s1 + $0x88] sm:$0xff]  }
  0x18   : > { %s1377_s27 = sshll.u32 %s191_s26, 3  ;;  %v1464_v35 = vld [vmem:[%s1930_s1 + $0x90] sm:$0xff]   ;;  %v1466_v36 = vld [vmem:[%s1930_s1 + $0x98] sm:$0xff]   ;;  %v1468_v37 = vld [vmem:[%s1930_s1 + $0xa0] sm:$0xff]  }
  0x19   : > { %s197_s30 = scalar_lea.vmem %s1929_s0, %s1377_s27  ;;  %v1370_v49 = vld.sshfl [vmem:[%s1931_s2] sm:$0x33 pattern:$0x75316420] }
  0x1a   : > { %v201_v1 = vld [vmem:[%s197_s30] sm:$0xff]  ;;  %v1089_v53 = vcombine.high %v1370_v49, %v1370_v49  ;;  %s1302_s30 = sshll.u32 %s186_s29, 2 }
  0x1b   : > { %v203_v2 = vcombine.high %v201_v1, %v201_v1  ;;  %v205_v3 = vpack.c.bf16 %v201_v1, %v201_v1  ;;  %s188_s5 = scalar_lea.vmem [#allocation2], %s1302_s30 }
  0x1c   : > { %v1801_v61 = vrot.slane %v1089_v53, %v1095_v54  ;;  %s1221_s6 = sshll.u32 %s188_s5, 4  ;;  %s1884_s6 = int_to_ptr.vmem [resolvable:$true] %s1221_s6 }
  0x1d   : > { %v206_v4 = vpack.c.bf16 %v203_v2, %v203_v2  ;;  %v530_v5 = vsel %vm528_vm0, %v205_v3, 0  ;;  %s1475_s15 = scalar_lea.vmem %s1884_s6, 64  ;;  %p1482_p1 = scmp.lt.s32.totalorder %s1884_s6, %s1480_s18 }
  0x1e   : > { %p1476_p12 = scmp.ne.s32.totalorder %s1884_s6, %s1475_s15  ;;  %p1483_p2 = scmp.lt.s32.totalorder %s1481_s19, %s1475_s15 }
  0x1f   : > { %1337 = vmatprep.subr.msk.bf16.mxu0 %vm528_vm0, %v206_v4  ;;  %1379 = vmatprep.subr.msk.bf16.mxu1 %vm528_vm0, %v206_v4 }
  0x20   : > { %536 = vmatpush1.bf16.msra.mxu0 %v530_v5  ;;  %1380 = vmatpush1.bf16.msra.mxu1 %v530_v5  ;;  %p1477_p13 = pnand %p1476_p12, %p1618_p4  ;;  %p1484_p3 = por %p1483_p2, %p1482_p1 }
  0x22   : > { %p1478_p0 = pneg %p1477_p13 }
  0x23   : > { %1338 = vmatmul.mubr.msk.bf16.vlgmr.msra.gmra.mrb[0].mxu0 %vm431_vm1, %v1443_v6  ;;  %1359 = vmatmul.mubr.msk.bf16.vlgmr.msra.gmra.mrb[0].mxu1 %vm431_vm1, %v1459_v7 }
  0x24   : > { %577 = vmatprep.mubr.bf16.mxu0 %v1555_v0  ;;  %787 = vmatprep.mubr.bf16.mxu1 %v1555_v0  ;;  %p1485_p5 = pnand %p1484_p3, %p1478_p0 }
  0x2b   : > { %1339 = vmatmul.mubr.msk.bf16.gmra.mrb[4].mxu0 %vm431_vm1, %v1444_v8  ;;  %1360 = vmatmul.mubr.msk.bf16.gmra.mrb[4].mxu1 %vm431_vm1, %v1461_v9 }
  0x2c   : > { %587 = vmatprep.mubr.bf16.mxu0 %v1555_v0  ;;  %797 = vmatprep.mubr.bf16.mxu1 %v1555_v0 }
  0x33   : > { %1340 = vmatmul.mubr.msk.bf16.gmra.mrb[8].mxu0 %vm431_vm1, %v1445_v10  ;;  %1361 = vmatmul.mubr.msk.bf16.gmra.mrb[8].mxu1 %vm431_vm1, %v1463_v11 }
  0x34   : > { %597 = vmatprep.mubr.bf16.mxu0 %v1555_v0  ;;  %807 = vmatprep.mubr.bf16.mxu1 %v1555_v0 }
  0x3b   : > { %1341 = vmatmul.mubr.msk.bf16.gmra.mrb[12].mxu0 %vm431_vm1, %v1446_v12  ;;  %1362 = vmatmul.mubr.msk.bf16.gmra.mrb[12].mxu1 %vm431_vm1, %v1465_v13 }
  0x3c   : > { %607 = vmatprep.mubr.bf16.mxu0 %v1555_v0  ;;  %817 = vmatprep.mubr.bf16.mxu1 %v1555_v0 }
  0x43   : > { %1342 = vmatmul.mubr.msk.bf16.gmra.mrb[16].mxu0 %vm431_vm1, %v1447_v14  ;;  %1363 = vmatmul.mubr.msk.bf16.gmra.mrb[16].mxu1 %vm431_vm1, %v1467_v15 }
  0x44   : > { %617 = vmatprep.mubr.bf16.mxu0 %v1555_v0  ;;  %827 = vmatprep.mubr.bf16.mxu1 %v1555_v0 }
  0x4b   : > { %1343 = vmatmul.mubr.msk.bf16.gmra.mrb[20].mxu0 %vm431_vm1, %v1448_v16  ;;  %1364 = vmatmul.mubr.msk.bf16.gmra.mrb[20].mxu1 %vm431_vm1, %v1469_v17 }
  0x4c   : > { %627 = vmatprep.mubr.bf16.mxu0 %v1555_v0  ;;  %837 = vmatprep.mubr.bf16.mxu1 %v1555_v0 }
  0x53   : > { %1344 = vmatmul.mubr.msk.bf16.gmra.mrb[24].mxu0 %vm431_vm1, %v1449_v18  ;;  %1365 = vmatmul.mubr.msk.bf16.gmra.mrb[24].mxu1 %vm431_vm1, %v1470_v19 }
  0x54   : > { %637 = vmatprep.mubr.bf16.mxu0 %v1555_v0  ;;  %847 = vmatprep.mubr.bf16.mxu1 %v1555_v0 }
  0x5b   : > { %1345 = vmatmul.mubr.msk.bf16.gmra.mrb[28].mxu0 %vm431_vm1, %v1450_v20  ;;  %1366 = vmatmul.mubr.msk.bf16.gmra.mrb[28].mxu1 %vm431_vm1, %v1471_v21 }
  0x5c   : > { %647 = vmatprep.mubr.bf16.mxu0 %v1555_v0  ;;  %857 = vmatprep.mubr.bf16.mxu1 %v1555_v0 }
  0x63   : > { %1346 = vmatmul.mubr.msk.bf16.gmra.mrb[32].mxu0 %vm431_vm1, %v1451_v22  ;;  %1367 = vmatmul.mubr.msk.bf16.gmra.mrb[32].mxu1 %vm431_vm1, %v1472_v23 }
  0x64   : > { %657 = vmatprep.mubr.bf16.mxu0 %v1555_v0  ;;  %867 = vmatprep.mubr.bf16.mxu1 %v1555_v0 }
  0x6b   : > { %1347 = vmatmul.mubr.msk.bf16.gmra.mrb[36].mxu0 %vm431_vm1, %v1452_v24  ;;  %1368 = vmatmul.mubr.msk.bf16.gmra.mrb[36].mxu1 %vm431_vm1, %v1473_v25 }
  0x6c   : > { %667 = vmatprep.mubr.bf16.mxu0 %v1555_v0  ;;  %877 = vmatprep.mubr.bf16.mxu1 %v1555_v0 }
  0x73   : > { %1348 = vmatmul.mubr.msk.bf16.gmra.mrb[40].mxu0 %vm431_vm1, %v1453_v26  ;;  %1369 = vmatmul.mubr.msk.bf16.gmra.mrb[40].mxu1 %vm431_vm1, %v1474_v27 }
  0x74   : > { %677 = vmatprep.mubr.bf16.mxu0 %v1555_v0  ;;  %1142 = vmatprep.mubr.bf16.mxu1 %v1801_v61 }
  0x7b   : > { %1349 = vmatmul.mubr.msk.bf16.gmra.mrb[44].mxu0 %vm431_vm1, %v1454_v28 }
  0x7c   : > { %687 = vmatprep.mubr.bf16.mxu0 %v1555_v0 }
  0x83   : > { %1350 = vmatmul.mubr.msk.bf16.gmra.mrb[48].mxu0 %vm431_vm1, %v1455_v29 }
  0x84   : > { %697 = vmatprep.mubr.bf16.mxu0 %v1555_v0 }
  0x8b   : > { %1351 = vmatmul.mubr.msk.bf16.gmra.mrb[52].mxu0 %vm431_vm1, %v1456_v30 }
  0x8c   : > { %707 = vmatprep.mubr.bf16.mxu0 %v1555_v0 }
  0x93   : > { %1352 = vmatmul.mubr.msk.bf16.gmra.mrb[56].mxu0 %vm431_vm1, %v1457_v31 }
  0x94   : > { %717 = vmatprep.mubr.bf16.mxu0 %v1555_v0 }
  0x9b   : > { %1353 = vmatmul.mubr.msk.bf16.gmra.mrb[60].mxu0 %vm431_vm1, %v1458_v32 }
  0x9c   : > { %727 = vmatprep.mubr.bf16.mxu0 %v1555_v0 }
  0xa3   : > { %1354 = vmatmul.mubr.msk.bf16.gmra.mrb[64].mxu0 %vm431_vm1, %v1460_v33 }
  0xa4   : > { %737 = vmatprep.mubr.bf16.mxu0 %v1555_v0 }
  0xab   : > { %1355 = vmatmul.mubr.msk.bf16.gmra.mrb[68].mxu0 %vm431_vm1, %v1462_v34 }
  0xac   : > { %747 = vmatprep.mubr.bf16.mxu0 %v1555_v0 }
  0xb3   : > { %1356 = vmatmul.mubr.msk.bf16.gmra.mrb[72].mxu0 %vm431_vm1, %v1464_v35 }
  0xb4   : > { %757 = vmatprep.mubr.bf16.mxu0 %v1555_v0 }
  0xbb   : > { %1357 = vmatmul.mubr.msk.bf16.gmra.mrb[76].mxu0 %vm431_vm1, %v1466_v36 }
  0xbc   : > { %767 = vmatprep.mubr.bf16.mxu0 %v1555_v0  ;;  %v1803_v0 = vrot.slane %v1370_v49, %v1095_v54 }
  0xc3   : > { %1358 = vmatmul.mubr.msk.bf16.gmra.mrb[80].mxu0 %vm431_vm1, %v1468_v37 }
  0xf6   : > { %v569_v38 = vpop.f32.mrb[0].mxu0  ;;  %v779_v52 = vpop.f32.mrb[0].mxu1 }
  0xf7   : > { %v571_v42 = vpop.f32.mrb[1].mxu0  ;;  %v888_v43 = vmax.f32 %v569_v38, 0.0  ;;  %v972_v56 = vmax.f32 %v779_v52, 0.0  ;;  %v781_v57 = vpop.f32.mrb[1].mxu1 }
  0xf8   : > { %v573_v44 = vpop.f32.mrb[2].mxu0  ;;  %v889_v50 = vmax.f32 %v571_v42, 0.0  ;;  %v973_v59 = vmax.f32 %v781_v57, 0.0  ;;  %v783_v60 = vpop.f32.mrb[2].mxu1 }
  0xf9   : > { %v890_v47 = vmax.f32 %v573_v44, 0.0  ;;  %v575_v48 = vpop.f32.mrb[3].mxu0  ;;  %v974_v62 = vmax.f32 %v783_v60, 0.0  ;;  %v785_v63 = vpop.f32.mrb[3].mxu1 }
  0xfa   : > { %v891_v51 = vmax.f32 %v575_v48, 0.0  ;;  %v975_v2 = vmax.f32 %v785_v63, 0.0 }
  0xfb   : > { %v1016_v55 = vpack.c.bf16 %v890_v47, %v888_v43  ;;  %v1806_v4 = vpack.c.bf16 %v974_v62, %v972_v56 }
  0xfc   : > { %v1017_v58 = vpack.c.bf16 %v891_v51, %v889_v50  ;;  %v1808_v6 = vpack.c.bf16 %v975_v2, %v973_v59 }
  0xfe   : > { %v579_v1 = vpop.f32.mrb[4].mxu0  ;;  %1110 = vmatprep.subr.bf16.mxu1 %v1017_v58  ;;  %v789_v12 = vpop.f32.mrb[4].mxu1 }
  0xff   : > { %v581_v3 = vpop.f32.mrb[5].mxu0  ;;  %1111 = vmatpush1.bf16.msra.mxu1 %v1016_v55  ;;  %v892_v7 = vmax.f32 %v579_v1, 0.0  ;;  %v976_v14 = vmax.f32 %v789_v12, 0.0  ;;  %v791_v15 = vpop.f32.mrb[5].mxu1 }
 0x100   : > { %v583_v5 = vpop.f32.mrb[6].mxu0  ;;  %v893_v10 = vmax.f32 %v581_v3, 0.0  ;;  %v977_v17 = vmax.f32 %v791_v15, 0.0  ;;  %v793_v18 = vpop.f32.mrb[6].mxu1 }
 0x101   : > { %v894_v8 = vmax.f32 %v583_v5, 0.0  ;;  %v585_v9 = vpop.f32.mrb[7].mxu0  ;;  %v978_v19 = vmax.f32 %v793_v18, 0.0  ;;  %v795_v20 = vpop.f32.mrb[7].mxu1 }
 0x102   : > { %v895_v11 = vmax.f32 %v585_v9, 0.0  ;;  %v979_v22 = vmax.f32 %v795_v20, 0.0 }
 0x103   : > { %v1018_v13 = vpack.c.bf16 %v894_v8, %v892_v7  ;;  %v1810_v24 = vpack.c.bf16 %v978_v19, %v976_v14 }
 0x104   : > { %v1019_v16 = vpack.c.bf16 %v895_v11, %v893_v10  ;;  %v1812_v26 = vpack.c.bf16 %v979_v22, %v977_v17 }
 0x106   : > { %v589_v21 = vpop.f32.mrb[8].mxu0  ;;  %1112 = vmatprep.subr.bf16.mxu1 %v1019_v16  ;;  %v799_v32 = vpop.f32.mrb[8].mxu1 }
 0x107   : > { %v591_v23 = vpop.f32.mrb[9].mxu0  ;;  %1113 = vmatpush1.bf16.msra.mxu1 %v1018_v13  ;;  %v896_v27 = vmax.f32 %v589_v21, 0.0  ;;  %v980_v34 = vmax.f32 %v799_v32, 0.0  ;;  %v801_v35 = vpop.f32.mrb[9].mxu1 }
 0x108   : > { %v593_v25 = vpop.f32.mrb[10].mxu0  ;;  %v897_v30 = vmax.f32 %v591_v23, 0.0  ;;  %v981_v37 = vmax.f32 %v801_v35, 0.0  ;;  %v803_v38 = vpop.f32.mrb[10].mxu1 }
 0x109   : > { %v898_v28 = vmax.f32 %v593_v25, 0.0  ;;  %v595_v29 = vpop.f32.mrb[11].mxu0  ;;  %v982_v39 = vmax.f32 %v803_v38, 0.0  ;;  %v805_v40 = vpop.f32.mrb[11].mxu1 }
 0x10a   : > { %v899_v31 = vmax.f32 %v595_v29, 0.0  ;;  %v983_v42 = vmax.f32 %v805_v40, 0.0 }
 0x10b   : > { %v1020_v33 = vpack.c.bf16 %v898_v28, %v896_v27  ;;  %v1814_v44 = vpack.c.bf16 %v982_v39, %v980_v34 }
 0x10c   : > { %v1021_v36 = vpack.c.bf16 %v899_v31, %v897_v30  ;;  %v1816_v46 = vpack.c.bf16 %v983_v42, %v981_v37 }
 0x10e   : > { %v599_v41 = vpop.f32.mrb[12].mxu0  ;;  %1114 = vmatprep.subr.bf16.mxu1 %v1021_v36  ;;  %v809_v52 = vpop.f32.mrb[12].mxu1 }
 0x10f   : > { %v601_v43 = vpop.f32.mrb[13].mxu0  ;;  %1115 = vmatpush1.bf16.msra.mxu1 %v1020_v33  ;;  %v900_v47 = vmax.f32 %v599_v41, 0.0  ;;  %v984_v54 = vmax.f32 %v809_v52, 0.0  ;;  %v811_v55 = vpop.f32.mrb[13].mxu1 }
 0x110   : > { %v603_v45 = vpop.f32.mrb[14].mxu0  ;;  %v901_v50 = vmax.f32 %v601_v43, 0.0  ;;  %v985_v57 = vmax.f32 %v811_v55, 0.0  ;;  %v813_v58 = vpop.f32.mrb[14].mxu1 }
 0x111   : > { %v902_v48 = vmax.f32 %v603_v45, 0.0  ;;  %v605_v49 = vpop.f32.mrb[15].mxu0  ;;  %v986_v59 = vmax.f32 %v813_v58, 0.0  ;;  %v815_v60 = vpop.f32.mrb[15].mxu1 }
 0x112   : > { %v903_v51 = vmax.f32 %v605_v49, 0.0  ;;  %v987_v63 = vmax.f32 %v815_v60, 0.0 }
 0x113   : > { %v1022_v53 = vpack.c.bf16 %v902_v48, %v900_v47  ;;  %v1818_v2 = vpack.c.bf16 %v986_v59, %v984_v54 }
 0x114   : > { %v1023_v56 = vpack.c.bf16 %v903_v51, %v901_v50  ;;  %v1820_v5 = vpack.c.bf16 %v987_v63, %v985_v57 }
 0x116   : > { %v609_v62 = vpop.f32.mrb[16].mxu0  ;;  %1116 = vmatprep.subr.bf16.mxu1 %v1023_v56  ;;  %v819_v12 = vpop.f32.mrb[16].mxu1 }
 0x117   : > { %v611_v1 = vpop.f32.mrb[17].mxu0  ;;  %1117 = vmatpush1.bf16.msra.mxu1 %v1022_v53  ;;  %v904_v7 = vmax.f32 %v609_v62, 0.0  ;;  %v988_v14 = vmax.f32 %v819_v12, 0.0  ;;  %v821_v15 = vpop.f32.mrb[17].mxu1 }
 0x118   : > { %v613_v3 = vpop.f32.mrb[18].mxu0  ;;  %v905_v10 = vmax.f32 %v611_v1, 0.0  ;;  %v989_v17 = vmax.f32 %v821_v15, 0.0  ;;  %v823_v18 = vpop.f32.mrb[18].mxu1 }
 0x119   : > { %v906_v8 = vmax.f32 %v613_v3, 0.0  ;;  %v615_v9 = vpop.f32.mrb[19].mxu0  ;;  %v990_v19 = vmax.f32 %v823_v18, 0.0  ;;  %v825_v20 = vpop.f32.mrb[19].mxu1 }
 0x11a   : > { %v907_v11 = vmax.f32 %v615_v9, 0.0  ;;  %v991_v22 = vmax.f32 %v825_v20, 0.0 }
 0x11b   : > { %v1024_v13 = vpack.c.bf16 %v906_v8, %v904_v7  ;;  %v1822_v25 = vpack.c.bf16 %v990_v19, %v988_v14 }
 0x11c   : > { %v1025_v16 = vpack.c.bf16 %v907_v11, %v905_v10  ;;  %v1824_v28 = vpack.c.bf16 %v991_v22, %v989_v17 }
 0x11e   : > { %v619_v21 = vpop.f32.mrb[20].mxu0  ;;  %1118 = vmatprep.subr.bf16.mxu1 %v1025_v16  ;;  %v829_v34 = vpop.f32.mrb[20].mxu1 }
 0x11f   : > { %v621_v23 = vpop.f32.mrb[21].mxu0  ;;  %1119 = vmatpush1.bf16.msra.mxu1 %v1024_v13  ;;  %v908_v29 = vmax.f32 %v619_v21, 0.0  ;;  %v992_v36 = vmax.f32 %v829_v34, 0.0  ;;  %v831_v37 = vpop.f32.mrb[21].mxu1 }
 0x120   : > { %v623_v27 = vpop.f32.mrb[22].mxu0  ;;  %v909_v32 = vmax.f32 %v621_v23, 0.0  ;;  %v993_v39 = vmax.f32 %v831_v37, 0.0  ;;  %v833_v40 = vpop.f32.mrb[22].mxu1 }
 0x121   : > { %v910_v30 = vmax.f32 %v623_v27, 0.0  ;;  %v625_v31 = vpop.f32.mrb[23].mxu0  ;;  %v994_v41 = vmax.f32 %v833_v40, 0.0  ;;  %v835_v42 = vpop.f32.mrb[23].mxu1 }
 0x122   : > { %v911_v33 = vmax.f32 %v625_v31, 0.0  ;;  %v995_v45 = vmax.f32 %v835_v42, 0.0 }
 0x123   : > { %v1026_v35 = vpack.c.bf16 %v910_v30, %v908_v29  ;;  %v1826_v48 = vpack.c.bf16 %v994_v41, %v992_v36 }
 0x124   : > { %v1027_v38 = vpack.c.bf16 %v911_v33, %v909_v32  ;;  %v1828_v50 = vpack.c.bf16 %v995_v45, %v993_v39 }
 0x126   : > { %v629_v43 = vpop.f32.mrb[24].mxu0  ;;  %1120 = vmatprep.subr.bf16.mxu1 %v1027_v38  ;;  %v839_v56 = vpop.f32.mrb[24].mxu1 }
 0x127   : > { %v631_v47 = vpop.f32.mrb[25].mxu0  ;;  %1121 = vmatpush1.bf16.msra.mxu1 %v1026_v35  ;;  %v912_v51 = vmax.f32 %v629_v43, 0.0  ;;  %v996_v58 = vmax.f32 %v839_v56, 0.0  ;;  %v841_v59 = vpop.f32.mrb[25].mxu1 }
 0x128   : > { %v633_v49 = vpop.f32.mrb[26].mxu0  ;;  %v913_v54 = vmax.f32 %v631_v47, 0.0  ;;  %v997_v62 = vmax.f32 %v841_v59, 0.0  ;;  %v843_v63 = vpop.f32.mrb[26].mxu1 }
 0x129   : > { %v914_v52 = vmax.f32 %v633_v49, 0.0  ;;  %v635_v53 = vpop.f32.mrb[27].mxu0  ;;  %v998_v1 = vmax.f32 %v843_v63, 0.0  ;;  %v845_v3 = vpop.f32.mrb[27].mxu1 }
 0x12a   : > { %v915_v55 = vmax.f32 %v635_v53, 0.0  ;;  %v999_v8 = vmax.f32 %v845_v3, 0.0 }
 0x12b   : > { %v1028_v57 = vpack.c.bf16 %v914_v52, %v912_v51  ;;  %v1830_v10 = vpack.c.bf16 %v998_v1, %v996_v58 }
 0x12c   : > { %v1029_v60 = vpack.c.bf16 %v915_v55, %v913_v54  ;;  %v1832_v12 = vpack.c.bf16 %v999_v8, %v997_v62 }
 0x12e   : > { %v639_v7 = vpop.f32.mrb[28].mxu0  ;;  %1122 = vmatprep.subr.bf16.mxu1 %v1029_v60  ;;  %v849_v18 = vpop.f32.mrb[28].mxu1 }
 0x12f   : > { %v641_v9 = vpop.f32.mrb[29].mxu0  ;;  %1123 = vmatpush1.bf16.msra.mxu1 %v1028_v57  ;;  %v916_v13 = vmax.f32 %v639_v7, 0.0  ;;  %v1000_v20 = vmax.f32 %v849_v18, 0.0  ;;  %v851_v21 = vpop.f32.mrb[29].mxu1 }
 0x130   : > { %v643_v11 = vpop.f32.mrb[30].mxu0  ;;  %v917_v16 = vmax.f32 %v641_v9, 0.0  ;;  %v1001_v23 = vmax.f32 %v851_v21, 0.0  ;;  %v853_v27 = vpop.f32.mrb[30].mxu1 }
 0x131   : > { %v918_v14 = vmax.f32 %v643_v11, 0.0  ;;  %v645_v15 = vpop.f32.mrb[31].mxu0  ;;  %v1002_v29 = vmax.f32 %v853_v27, 0.0  ;;  %v855_v30 = vpop.f32.mrb[31].mxu1 }
 0x132   : > { %v919_v17 = vmax.f32 %v645_v15, 0.0  ;;  %v1003_v32 = vmax.f32 %v855_v30, 0.0 }
 0x133   : > { %v1030_v19 = vpack.c.bf16 %v918_v14, %v916_v13  ;;  %v1834_v34 = vpack.c.bf16 %v1002_v29, %v1000_v20 }
 0x134   : > { %v1031_v22 = vpack.c.bf16 %v919_v17, %v917_v16  ;;  %v1836_v36 = vpack.c.bf16 %v1003_v32, %v1001_v23 }
 0x136   : > { %v649_v31 = vpop.f32.mrb[32].mxu0  ;;  %1124 = vmatprep.subr.bf16.mxu1 %v1031_v22  ;;  %v859_v42 = vpop.f32.mrb[32].mxu1 }
 0x137   : > { %v651_v33 = vpop.f32.mrb[33].mxu0  ;;  %1125 = vmatpush1.bf16.msra.mxu1 %v1030_v19  ;;  %v920_v37 = vmax.f32 %v649_v31, 0.0  ;;  %v1004_v45 = vmax.f32 %v859_v42, 0.0  ;;  %v861_v47 = vpop.f32.mrb[33].mxu1 }
 0x138   : > { %v653_v35 = vpop.f32.mrb[34].mxu0  ;;  %v921_v40 = vmax.f32 %v651_v33, 0.0  ;;  %v1005_v51 = vmax.f32 %v861_v47, 0.0  ;;  %v863_v52 = vpop.f32.mrb[34].mxu1 }
 0x139   : > { %v922_v38 = vmax.f32 %v653_v35, 0.0  ;;  %v655_v39 = vpop.f32.mrb[35].mxu0  ;;  %v1006_v53 = vmax.f32 %v863_v52, 0.0  ;;  %v865_v54 = vpop.f32.mrb[35].mxu1 }
 0x13a   : > { %v923_v41 = vmax.f32 %v655_v39, 0.0  ;;  %v1007_v56 = vmax.f32 %v865_v54, 0.0 }
 0x13b   : > { %v1032_v43 = vpack.c.bf16 %v922_v38, %v920_v37  ;;  %v1838_v58 = vpack.c.bf16 %v1006_v53, %v1004_v45 }
 0x13c   : > { %v1033_v49 = vpack.c.bf16 %v923_v41, %v921_v40  ;;  %v1840_v60 = vpack.c.bf16 %v1007_v56, %v1005_v51 }
 0x13e   : > { %v659_v55 = vpop.f32.mrb[36].mxu0  ;;  %1126 = vmatprep.subr.bf16.mxu1 %v1033_v49  ;;  %v869_v8 = vpop.f32.mrb[36].mxu1 }
 0x13f   : > { %v661_v57 = vpop.f32.mrb[37].mxu0  ;;  %1127 = vmatpush1.bf16.msra.mxu1 %v1032_v43  ;;  %v924_v62 = vmax.f32 %v659_v55, 0.0  ;;  %v1008_v11 = vmax.f32 %v869_v8, 0.0  ;;  %v871_v13 = vpop.f32.mrb[37].mxu1 }
 0x140   : > { %v663_v59 = vpop.f32.mrb[38].mxu0  ;;  %v925_v3 = vmax.f32 %v661_v57, 0.0  ;;  %v1009_v15 = vmax.f32 %v871_v13, 0.0  ;;  %v873_v16 = vpop.f32.mrb[38].mxu1 }
 0x141   : > { %v926_v63 = vmax.f32 %v663_v59, 0.0  ;;  %v665_v1 = vpop.f32.mrb[39].mxu0  ;;  %v1010_v17 = vmax.f32 %v873_v16, 0.0  ;;  %v875_v18 = vpop.f32.mrb[39].mxu1 }
 0x142   : > { %v927_v7 = vmax.f32 %v665_v1, 0.0  ;;  %v1011_v20 = vmax.f32 %v875_v18, 0.0 }
 0x143   : > { %v1034_v9 = vpack.c.bf16 %v926_v63, %v924_v62  ;;  %v1842_v22 = vpack.c.bf16 %v1010_v17, %v1008_v11 }
 0x144   : > { %v1035_v14 = vpack.c.bf16 %v927_v7, %v925_v3  ;;  %v1844_v27 = vpack.c.bf16 %v1011_v20, %v1009_v15 }
 0x146   : > { %v669_v19 = vpop.f32.mrb[40].mxu0  ;;  %1128 = vmatprep.subr.bf16.mxu1 %v1035_v14  ;;  %v879_v35 = vpop.f32.mrb[40].mxu1 }
 0x147   : > { %v671_v21 = vpop.f32.mrb[41].mxu0  ;;  %1129 = vmatpush1.bf16.msra.mxu1 %v1034_v9  ;;  %v928_v29 = vmax.f32 %v669_v19, 0.0  ;;  %v1012_v38 = vmax.f32 %v879_v35, 0.0  ;;  %v881_v39 = vpop.f32.mrb[41].mxu1 }
 0x148   : > { %v673_v23 = vpop.f32.mrb[42].mxu0  ;;  %v929_v32 = vmax.f32 %v671_v21, 0.0  ;;  %v1013_v41 = vmax.f32 %v881_v39, 0.0  ;;  %v883_v42 = vpop.f32.mrb[42].mxu1 }
 0x149   : > { %v930_v30 = vmax.f32 %v673_v23, 0.0  ;;  %v675_v31 = vpop.f32.mrb[43].mxu0  ;;  %v1014_v43 = vmax.f32 %v883_v42, 0.0  ;;  %v885_v45 = vpop.f32.mrb[43].mxu1 }
 0x14a   : > { %v931_v33 = vmax.f32 %v675_v31, 0.0  ;;  %v1015_v49 = vmax.f32 %v885_v45, 0.0 }
 0x14b   : > { %v1036_v37 = vpack.c.bf16 %v930_v30, %v928_v29  ;;  %v1846_v52 = vpack.c.bf16 %v1014_v43, %v1012_v38 }
 0x14c   : > { %v1037_v40 = vpack.c.bf16 %v931_v33, %v929_v32  ;;  %v1848_v54 = vpack.c.bf16 %v1015_v49, %v1013_v41 }
 0x14e   : > { %v679_v47 = vpop.f32.mrb[44].mxu0  ;;  %1130 = vmatprep.subr.bf16.mxu1 %v1037_v40 }
 0x14f   : > { %v681_v51 = vpop.f32.mrb[45].mxu0  ;;  %1131 = vmatpush1.bf16.msra.mxu1 %v1036_v37  ;;  %v932_v55 = vmax.f32 %v679_v47, 0.0 }
 0x150   : > { %v683_v53 = vpop.f32.mrb[46].mxu0  ;;  %v933_v59 = vmax.f32 %v681_v51, 0.0 }
 0x151   : > { %v934_v56 = vmax.f32 %v683_v53, 0.0  ;;  %v685_v57 = vpop.f32.mrb[47].mxu0 }
 0x152   : > { %v935_v62 = vmax.f32 %v685_v57, 0.0 }
 0x153   : > { %v1038_v63 = vpack.c.bf16 %v934_v56, %v932_v55 }
 0x154   : > { %v1039_v1 = vpack.c.bf16 %v935_v62, %v933_v59 }
 0x156   : > { %v689_v3 = vpop.f32.mrb[48].mxu0  ;;  %1132 = vmatprep.subr.bf16.mxu1 %v1039_v1 }
 0x157   : > { %v691_v7 = vpop.f32.mrb[49].mxu0  ;;  %1133 = vmatpush1.bf16.msra.mxu1 %v1038_v63  ;;  %v936_v9 = vmax.f32 %v689_v3, 0.0 }
 0x158   : > { %v693_v8 = vpop.f32.mrb[50].mxu0  ;;  %v937_v14 = vmax.f32 %v691_v7, 0.0 }
 0x159   : > { %v938_v11 = vmax.f32 %v693_v8, 0.0  ;;  %v695_v13 = vpop.f32.mrb[51].mxu0  ;;  %v1105_v8 = vcombine.high %v1801_v61, %v1801_v61 }
 0x15a   : > { %v939_v15 = vmax.f32 %v695_v13, 0.0 }
 0x15b   : > { %v1040_v16 = vpack.c.bf16 %v938_v11, %v936_v9 }
 0x15c   : > { %v1041_v17 = vpack.c.bf16 %v939_v15, %v937_v14 }
 0x15e   : > { %v699_v18 = vpop.f32.mrb[52].mxu0  ;;  %1134 = vmatprep.subr.bf16.mxu1 %v1041_v17 }
 0x15f   : > { %v701_v19 = vpop.f32.mrb[53].mxu0  ;;  %1135 = vmatpush1.bf16.msra.mxu1 %v1040_v16  ;;  %v940_v21 = vmax.f32 %v699_v18, 0.0 }
 0x160   : > { %v703_v20 = vpop.f32.mrb[54].mxu0  ;;  %v941_v30 = vmax.f32 %v701_v19, 0.0 }
 0x161   : > { %v942_v23 = vmax.f32 %v703_v20, 0.0  ;;  %v705_v29 = vpop.f32.mrb[55].mxu0 }
 0x162   : > { %v943_v31 = vmax.f32 %v705_v29, 0.0 }
 0x163   : > { %v1042_v32 = vpack.c.bf16 %v942_v23, %v940_v21 }
 0x164   : > { %v1043_v33 = vpack.c.bf16 %v943_v31, %v941_v30 }
 0x166   : > { %v709_v35 = vpop.f32.mrb[56].mxu0  ;;  %1136 = vmatprep.subr.bf16.mxu1 %v1043_v33 }
 0x167   : > { %v711_v37 = vpop.f32.mrb[57].mxu0  ;;  %1137 = vmatpush1.bf16.msra.mxu1 %v1042_v32  ;;  %v944_v39 = vmax.f32 %v709_v35, 0.0 }
 0x168   : > { %v713_v38 = vpop.f32.mrb[58].mxu0  ;;  %v945_v42 = vmax.f32 %v711_v37, 0.0 }
 0x169   : > { %v946_v40 = vmax.f32 %v713_v38, 0.0  ;;  %v715_v41 = vpop.f32.mrb[59].mxu0 }
 0x16a   : > { %v947_v43 = vmax.f32 %v715_v41, 0.0 }
 0x16b   : > { %v1044_v45 = vpack.c.bf16 %v946_v40, %v944_v39 }
 0x16c   : > { %v1045_v47 = vpack.c.bf16 %v947_v43, %v945_v42 }
 0x16e   : > { %v719_v49 = vpop.f32.mrb[60].mxu0  ;;  %1138 = vmatprep.subr.bf16.mxu1 %v1045_v47 }
 0x16f   : > { %v721_v51 = vpop.f32.mrb[61].mxu0  ;;  %1139 = vmatpush1.bf16.msra.mxu1 %v1044_v45  ;;  %v948_v55 = vmax.f32 %v719_v49, 0.0 }
 0x170   : > { %v723_v53 = vpop.f32.mrb[62].mxu0  ;;  %v949_v59 = vmax.f32 %v721_v51, 0.0 }
 0x171   : > { %v950_v56 = vmax.f32 %v723_v53, 0.0  ;;  %v725_v57 = vpop.f32.mrb[63].mxu0 }
 0x172   : > { %v951_v62 = vmax.f32 %v725_v57, 0.0 }
 0x173   : > { %v1046_v63 = vpack.c.bf16 %v950_v56, %v948_v55 }
 0x174   : > { %v1047_v1 = vpack.c.bf16 %v951_v62, %v949_v59 }
 0x176   : > { %v729_v3 = vpop.f32.mrb[64].mxu0  ;;  %1140 = vmatprep.subr.bf16.mxu1 %v1047_v1 }
 0x177   : > { %v731_v7 = vpop.f32.mrb[65].mxu0  ;;  %1141 = vmatpush1.bf16.msra.mxu1 %v1046_v63  ;;  %v952_v11 = vmax.f32 %v729_v3, 0.0 }
 0x178   : > { %v733_v9 = vpop.f32.mrb[66].mxu0  ;;  %v953_v15 = vmax.f32 %v731_v7, 0.0 }
 0x179   : > { %v954_v13 = vmax.f32 %v733_v9, 0.0  ;;  %v735_v14 = vpop.f32.mrb[67].mxu0 }
 0x17a   : > { %v955_v16 = vmax.f32 %v735_v14, 0.0  ;;  %1143 = vmatmul.mubr.bf16.vlgmr.msra.gmra.mrb[44].mxu1 %v1803_v0 }
 0x17b   : > { %v1048_v17 = vpack.c.bf16 %v954_v13, %v952_v11  ;;  %1183 = vmatprep.mubr.bf16.mxu1 %v1105_v8 }
 0x17c   : > { %v1049_v18 = vpack.c.bf16 %v955_v16, %v953_v15 }
 0x17e   : > { %v739_v19 = vpop.f32.mrb[68].mxu0  ;;  %1151 = vmatprep.subr.bf16.mxu1 %v1049_v18 }
 0x17f   : > { %v741_v20 = vpop.f32.mrb[69].mxu0  ;;  %1152 = vmatpush1.bf16.msra.mxu1 %v1048_v17  ;;  %v956_v23 = vmax.f32 %v739_v19, 0.0 }
 0x180   : > { %v743_v21 = vpop.f32.mrb[70].mxu0  ;;  %v957_v61 = vmax.f32 %v741_v20, 0.0 }
 0x181   : > { %v958_v29 = vmax.f32 %v743_v21, 0.0  ;;  %v745_v30 = vpop.f32.mrb[71].mxu0 }
 0x182   : > { %v959_v31 = vmax.f32 %v745_v30, 0.0 }
 0x183   : > { %v1050_v32 = vpack.c.bf16 %v958_v29, %v956_v23 }
 0x184   : > { %v1051_v33 = vpack.c.bf16 %v959_v31, %v957_v61 }
 0x186   : > { %v749_v35 = vpop.f32.mrb[72].mxu0  ;;  %1153 = vmatprep.subr.bf16.mxu1 %v1051_v33 }
 0x187   : > { %v751_v37 = vpop.f32.mrb[73].mxu0  ;;  %1154 = vmatpush1.bf16.msra.mxu1 %v1050_v32  ;;  %v960_v39 = vmax.f32 %v749_v35, 0.0 }
 0x188   : > { %v753_v38 = vpop.f32.mrb[74].mxu0  ;;  %v961_v42 = vmax.f32 %v751_v37, 0.0 }
 0x189   : > { %v962_v40 = vmax.f32 %v753_v38, 0.0  ;;  %v755_v41 = vpop.f32.mrb[75].mxu0 }
 0x18a   : > { %v963_v43 = vmax.f32 %v755_v41, 0.0 }
 0x18b   : > { %v1052_v45 = vpack.c.bf16 %v962_v40, %v960_v39 }
 0x18c   : > { %v1053_v47 = vpack.c.bf16 %v963_v43, %v961_v42 }
 0x18e   : > { %v759_v49 = vpop.f32.mrb[76].mxu0  ;;  %1155 = vmatprep.subr.bf16.mxu1 %v1053_v47 }
 0x18f   : > { %v761_v51 = vpop.f32.mrb[77].mxu0  ;;  %1156 = vmatpush1.bf16.msra.mxu1 %v1052_v45  ;;  %v964_v55 = vmax.f32 %v759_v49, 0.0 }
 0x190   : > { %v763_v53 = vpop.f32.mrb[78].mxu0  ;;  %v965_v59 = vmax.f32 %v761_v51, 0.0 }
 0x191   : > { %v966_v56 = vmax.f32 %v763_v53, 0.0  ;;  %v765_v57 = vpop.f32.mrb[79].mxu0 }
 0x192   : > { %v967_v62 = vmax.f32 %v765_v57, 0.0 }
 0x193   : > { %v1054_v63 = vpack.c.bf16 %v966_v56, %v964_v55 }
 0x194   : > { %v1055_v1 = vpack.c.bf16 %v967_v62, %v965_v59 }
 0x196   : > { %v769_v3 = vpop.f32.mrb[80].mxu0  ;;  %1157 = vmatprep.subr.bf16.mxu1 %v1055_v1 }
 0x197   : > { %v771_v7 = vpop.f32.mrb[81].mxu0  ;;  %1158 = vmatpush1.bf16.msra.mxu1 %v1054_v63  ;;  %v968_v9 = vmax.f32 %v769_v3, 0.0 }
 0x198   : > { %v773_v8 = vpop.f32.mrb[82].mxu0  ;;  %v969_v14 = vmax.f32 %v771_v7, 0.0 }
 0x199   : > { %v970_v11 = vmax.f32 %v773_v8, 0.0  ;;  %v775_v13 = vpop.f32.mrb[83].mxu0 }
 0x19a   : > { %v971_v15 = vmax.f32 %v775_v13, 0.0 }
 0x19b   : > { %v1056_v16 = vpack.c.bf16 %v970_v11, %v968_v9 }
 0x19c   : > { %v1057_v17 = vpack.c.bf16 %v971_v15, %v969_v14 }
 0x19e   : > { %1159 = vmatprep.subr.bf16.mxu1 %v1057_v17 }
 0x19f   : > { %1160 = vmatpush1.bf16.msra.mxu1 %v1056_v16 }
 0x1a0   : > { %1161 = vmatprep.subr.bf16.mxu1 %v1808_v6 }
 0x1a3   : > { %1162 = vmatpush1.bf16.msra.mxu1 %v1806_v4  ;;  %v1104_v4 = vcombine.high %v1803_v0, %v1803_v0 }
 0x1a4   : > { %1163 = vmatprep.subr.bf16.mxu1 %v1812_v26 }
 0x1a7   : > { %1164 = vmatpush1.bf16.msra.mxu1 %v1810_v24 }
 0x1a8   : > { %1165 = vmatprep.subr.bf16.mxu1 %v1816_v46 }
 0x1ab   : > { %1166 = vmatpush1.bf16.msra.mxu1 %v1814_v44 }
 0x1ac   : > { %1167 = vmatprep.subr.bf16.mxu1 %v1820_v5 }
 0x1af   : > { %1168 = vmatpush1.bf16.msra.mxu1 %v1818_v2 }
 0x1b0   : > { %1169 = vmatprep.subr.bf16.mxu1 %v1824_v28 }
 0x1b3   : > { %1170 = vmatpush1.bf16.msra.mxu1 %v1822_v25 }
 0x1b4   : > { %1171 = vmatprep.subr.bf16.mxu1 %v1828_v50 }
 0x1b7   : > { %1172 = vmatpush1.bf16.msra.mxu1 %v1826_v48 }
 0x1b8   : > { %1173 = vmatprep.subr.bf16.mxu1 %v1832_v12 }
 0x1bb   : > { %1174 = vmatpush1.bf16.msra.mxu1 %v1830_v10 }
 0x1bc   : > { %1175 = vmatprep.subr.bf16.mxu1 %v1836_v36 }
 0x1bf   : > { %1176 = vmatpush1.bf16.msra.mxu1 %v1834_v34 }
 0x1c0   : > { %1177 = vmatprep.subr.bf16.mxu1 %v1840_v60 }
 0x1c3   : > { %1178 = vmatpush1.bf16.msra.mxu1 %v1838_v58 }
 0x1c4   : > { %1179 = vmatprep.subr.bf16.mxu1 %v1844_v27 }
 0x1c7   : > { %1180 = vmatpush1.bf16.msra.mxu1 %v1842_v22 }
 0x1c8   : > { %1181 = vmatprep.subr.bf16.mxu1 %v1848_v54 }
 0x1cb   : > { %1182 = vmatpush1.bf16.msra.mxu1 %v1846_v52 }
 0x1ce   : > { %1184 = vmatmul.mubr.bf16.vlgmr.msra.gmra.mrb[44].mxu1 %v1104_v4 }
 0x2a1   : > { %v1185_v6 = vpop.f32.mrb[44].mxu1 }
 0x2a2   : > { %v1187_v24 = vpop.f32.mrb[45].mxu1 }
 0x2a3   : > { %v1194_v26 = vcombine.low %v1185_v6, %v1187_v24  ;;  %v1189_v44 = vpop.f32.mrb[46].mxu1 }
 0x2a4   : > { %v1190_v0 = vpop.f32.mrb[47].mxu1 }
 0x2a5   : > { %1371 = vst.sshfl [vmem:[%s188_s5] sm:$0x33 pattern:$0x76325410] %v1194_v26 }
 0x2a6   : > { %1488 = shalt.err (!%p1485_p5)
}
 0x2a7   : > { %s1489_s21 = scalar_lea.hbm %s1882_s9, 64  ;;  %s1493_s27 = scalar_lea.hbm %s1932_s3, 128 }
 0x2a8   : > { %p1490_p6 = scmp.ne.s32.totalorder %s1882_s9, %s1489_s21  ;;  %p1494_p10 = scmp.lt.u32.totalorder %s1882_s9, %s1932_s3 }
 0x2a9   : > { %p1495_p11 = scmp.lt.u32.totalorder %s1493_s27, %s1489_s21  ;;  %p1497_p13 = scmp.lt.u32.totalorder %s1489_s21, %s1882_s9 }
 0x2aa   : > { %p1491_p7 = pnand %p1490_p6, %p1618_p4 }
 0x2ab   : > { %p1496_p12 = por %p1495_p11, %p1494_p10 }
 0x2ac   : > { %p1492_p9 = pneg %p1491_p7 }
 0x2ad   : > { %p1498_p0 = por %p1497_p13, %p1496_p12 }
 0x2af   : > { %p1499_p1 = pnand %p1498_p0, %p1492_p9 }
 0x2b1   : > { %1502 = shalt.err (!%p1499_p1)
}
 0x2b2   : > { %1385 = dma.vmem_to_hbm [thread:$0]  (%p1618_p4), %s1884_s6, 64, %s1882_s9, %s1205_s10  }
 0x2b3 PF: > { %p1391_p2 = scmp.ge.s32.totalorder %s1553_s17, 2  ;;  %s1233_s30 = sand.u32 1, %s1533_s12  }
 0x2b4   : > { %s1234_s4 = scalar_lea.sflag [#allocation3], %s1233_s30 }
 0x2b5   : > { %p1388_p3 = pnand %p1391_p2, %p1625_p8 }
 0x2b7   : > { %1528 = dma.done.wait (!%p1388_p3), %s1234_s4, 64  }
 0x2b8   : > { %1530 = vsyncadd (!%p1388_p3), %s1234_s4, 4294967232  ;;  %s16_s17 = sadd.s32 1, %s1553_s17   ;;  %s1935_s12 = smov %s1537_s13 }
 0x2b9   : > { %p13_p5 = scmp.ge.s32.totalorder %s16_s17, 4   ;;  %s1936_s13 = smov %s1541_s14 }
 0x2ba   : > { %s1937_s14 = smov %s1631_s25  ;;  %s1938_s15 = smov %s1549_s16 }
 0x2bb   : > { %s1939_s16 = smov %s1941_s20  ;;  %15 = sbr.rel (!%p13_p5) target bundleno = 4 (0x4), region = 67 }
 0x2c2   :  { %1239 = vsyncpa [#allocation3], 1 }
 0x2c3   :  { %1241 = vsyncpa [#allocation3 + $0x1], 1 }

// kernel: tpu_custom_call.1
= control target key start
LH: loop header
LB: loop body
LE: loop exit
PB: predicated region body
PF: predicated region fallthrough
CT: control target
= control target key end

     0   :  { %8 = vsyncpa [#allocation3], 0  ;;  %s1929_s0 = inlined_call_operand.vmem [shape: f32[2,4,256], index: 0, kind: input, shape index: {}]   ;;  %s1930_s1 = inlined_call_operand.vmem [shape: bf16[512,4], index: 1, kind: input, shape index: {}]   ;;  %s1931_s2 = inlined_call_operand.vmem [shape: bf16[2,512], index: 2, kind: input, shape index: {}]   ;;  %s1932_s3 = inlined_call_operand.hbm [shape: f32[2,2,256], index: 3, kind: output, shape index: {}]  }
   0x1   :  { %10 = vsyncpa [#allocation3 + $0x1], 0  ;;  %s1578_s12 = smov 0   ;;  %s1580_s13 = smov 0  }
   0x2   :  { %s1582_s14 = smov 0   ;;  %s1584_s15 = smov 0  }
   0x3   :  { %s1586_s16 = smov 0   ;;  %s1588_s17 = smov 0  }
   0x4 LB: > { %s1297_s18 = sadd.s32 4294967295, %s1553_s17   ;;  %s1298_s19 = sadd.s32 4294967294, %s1553_s17   ;;  %s1553_s17 = sphi %s1588_s17, %s16_s17   ;;  %s1549_s16 = sphi %s1586_s16, %s1939_s16   ;;  %s1545_s15 = sphi %s1584_s15, %s1938_s15   ;;  %s1541_s14 = sphi %s1582_s14, %s1937_s14   ;;  %s1537_s13 = sphi %s1580_s13, %s1936_s13   ;;  %s1533_s12 = sphi %s1578_s12, %s1935_s12  }
   0x5   : > { %s28_s20 = sadd.s32 1, %s1549_s16  ;;  %s107_s21 = sadd.s32 1, %s1541_s14 }
   0x6   : > { %p30_p0 = scmp.ge.s32.totalorder %s28_s20, 2  ;;  %p117_p1 = scmp.ne.s32.totalorder %s1541_s14, %s1537_s13 }
   0x7   : > { %p118_p2 = scmp.eq.s32.totalorder %s1297_s18, 1  ;;  %p123_p3 = scmp.ne.s32.totalorder %s1537_s13, %s1533_s12 }
   0x8   : > { %s1941_s20 = smov (%p30_p0, %s28_s20), 0  ;;  %p124_p5 = scmp.eq.s32.totalorder %s1298_s19, 1 }
   0x9   : > { %p1618_p4 = por %p118_p2, %p117_p1  ;;  %s102_s23 = ssub.s32 %s1549_s16, %s1941_s20 }
   0xa   : > { %p1301_p6 = scmp.ge.s32.totalorder %s1553_s17, 1  ;;  %p105_p7 = scmp.eq.s32.totalorder %s102_s23, 0 }
   0xb   : > { %p1625_p8 = por %p124_p5, %p123_p3  ;;  %p161_p9 = scmp.lt.s32.totalorder %s1553_s17, 3 }
   0xc   : > { %s1631_s25 = scalar_select %p105_p7, %s1541_s14, %s107_s21  }
   0xd   : > { %p162_p10 = pnand %p1301_p6, %p161_p9 }
   0xe   : > { %p190_p11 = scmp.lt.s32.totalorder (!%p162_p10), %s1545_s15, 1  ;;  %v1555_v0 = vmov (!%p162_p10), 0   ;;  %vm528_vm0 = vcmask (!%p162_p10), 1041408   ;;  %v1443_v6 = vld [vmem:[%s1930_s1] sm:$0xff] (!%p162_p10)   ;;  %vm431_vm1 = vcmask (!%p162_p10), 31744   ;;  %v1459_v7 = vld [vmem:[%s1930_s1 + $0xa8] sm:$0xff] (!%p162_p10)   ;;  %v1093_v41 = vlaneseq (!%p162_p10) }
   0xf   : > { %165 = sbr.rel (%p162_p10) target bundleno = 691 (0x2b3), region = 32  ;;  %567 = vmatprep.mubr.bf16.mxu0 (!%p162_p10), %v1555_v0  ;;  %777 = vmatprep.mubr.bf16.mxu1 (!%p162_p10), %v1555_v0  ;;  %v1444_v8 = vld [vmem:[%s1930_s1 + $0x8] sm:$0xff] (!%p162_p10)   ;;  %v1461_v9 = vld [vmem:[%s1930_s1 + $0xb0] sm:$0xff] (!%p162_p10)   ;;  %v1463_v11 = vld [vmem:[%s1930_s1 + $0xb8] sm:$0xff] (!%p162_p10)   ;;  %v1556_v39 = vmov (!%p162_p10), 1966171168  }
  0x10   : > { %v1445_v10 = vld [vmem:[%s1930_s1 + $0x10] sm:$0xff] (!%p162_p10)   ;;  %v1446_v12 = vld [vmem:[%s1930_s1 + $0x18] sm:$0xff] (!%p162_p10)   ;;  %v1465_v13 = vld [vmem:[%s1930_s1 + $0xc0] sm:$0xff] (!%p162_p10)   ;;  %v1091_v40 = vunpack.c.l.s4 (!%p162_p10), %v1556_v39  ;;  %v1094_v46 = vshrl.u32 (!%p162_p10), %v1093_v41, 7  ;;  %s186_s29 = sand.u32 (!%p162_p10), 1, %s1537_s13   ;;  %s1378_s4 = sshll.u32 (!%p162_p10), %s1545_s15, 6 }
  0x11   : > { %v1447_v14 = vld [vmem:[%s1930_s1 + $0x20] sm:$0xff] (!%p162_p10)   ;;  %v1467_v15 = vld [vmem:[%s1930_s1 + $0xc8] sm:$0xff] (!%p162_p10)   ;;  %v1469_v17 = vld [vmem:[%s1930_s1 + $0xd0] sm:$0xff] (!%p162_p10)   ;;  %s1882_s9 = scalar_lea.hbm (!%p162_p10), %s1932_s3, %s1378_s4  ;;  %s1205_s10 = scalar_lea.sflag (!%p162_p10), [#allocation3], %s186_s29 }
  0x12   : > { %v1448_v16 = vld [vmem:[%s1930_s1 + $0x28] sm:$0xff] (!%p162_p10)   ;;  %v1449_v18 = vld [vmem:[%s1930_s1 + $0x30] sm:$0xff] (!%p162_p10)   ;;  %v1470_v19 = vld [vmem:[%s1930_s1 + $0xd8] sm:$0xff] (!%p162_p10)   ;;  %v1092_v45 = vunpack.c.0.s8 (!%p162_p10), %v1091_v40  ;;  %s1557_s11 = smov (!%p162_p10), [#allocation2]  }
  0x13   : > { %v1450_v20 = vld [vmem:[%s1930_s1 + $0x38] sm:$0xff] (!%p162_p10)   ;;  %v1471_v21 = vld [vmem:[%s1930_s1 + $0xe0] sm:$0xff] (!%p162_p10)   ;;  %v1472_v23 = vld [vmem:[%s1930_s1 + $0xe8] sm:$0xff] (!%p162_p10)   ;;  %s1479_s18 = sshll.u32 (!%p162_p10), %s1557_s11, 4  ;;  %s1480_s18 = int_to_ptr.vmem [resolvable:$false] %s1479_s18 }
  0x14   : > { %v1451_v22 = vld [vmem:[%s1930_s1 + $0x40] sm:$0xff] (!%p162_p10)   ;;  %v1452_v24 = vld [vmem:[%s1930_s1 + $0x48] sm:$0xff] (!%p162_p10)   ;;  %v1473_v25 = vld [vmem:[%s1930_s1 + $0xf0] sm:$0xff] (!%p162_p10)   ;;  %v1095_v54 = vsub.s32 (!%p162_p10), %v1092_v45, %v1094_v46  ;;  %s1481_s19 = scalar_lea.vmem (!%p162_p10), %s1480_s18, 128 }
  0x15   : > { %v1453_v26 = vld [vmem:[%s1930_s1 + $0x50] sm:$0xff] (!%p162_p10)   ;;  %v1474_v27 = vld [vmem:[%s1930_s1 + $0xf8] sm:$0xff] (!%p162_p10)   ;;  %v1455_v29 = vld [vmem:[%s1930_s1 + $0x60] sm:$0xff] (!%p162_p10)  }
  0x16   : > { %s191_s26 = scalar_select %p190_p11, %s1545_s15, 1  ;;  %v1454_v28 = vld [vmem:[%s1930_s1 + $0x58] sm:$0xff]   ;;  %v1456_v30 = vld [vmem:[%s1930_s1 + $0x68] sm:$0xff]   ;;  %v1457_v31 = vld [vmem:[%s1930_s1 + $0x70] sm:$0xff]  }
  0x17   : > { %v1458_v32 = vld [vmem:[%s1930_s1 + $0x78] sm:$0xff]   ;;  %v1460_v33 = vld [vmem:[%s1930_s1 + $0x80] sm:$0xff]   ;;  %v1462_v34 = vld [vmem:[%s1930_s1 + $0x88] sm:$0xff]  }
  0x18   : > { %s1377_s27 = sshll.u32 %s191_s26, 3  ;;  %v1464_v35 = vld [vmem:[%s1930_s1 + $0x90] sm:$0xff]   ;;  %v1466_v36 = vld [vmem:[%s1930_s1 + $0x98] sm:$0xff]   ;;  %v1468_v37 = vld [vmem:[%s1930_s1 + $0xa0] sm:$0xff]  }
  0x19   : > { %s197_s30 = scalar_lea.vmem %s1929_s0, %s1377_s27  ;;  %v1370_v49 = vld.sshfl [vmem:[%s1931_s2] sm:$0x33 pattern:$0x75316420] }
  0x1a   : > { %v201_v1 = vld [vmem:[%s197_s30] sm:$0xff]  ;;  %v1089_v53 = vcombine.high %v1370_v49, %v1370_v49  ;;  %s1302_s30 = sshll.u32 %s186_s29, 2 }
  0x1b   : > { %v203_v2 = vcombine.high %v201_v1, %v201_v1  ;;  %v205_v3 = vpack.c.bf16 %v201_v1, %v201_v1  ;;  %s188_s5 = scalar_lea.vmem [#allocation2], %s1302_s30 }
  0x1c   : > { %v1801_v61 = vrot.slane %v1089_v53, %v1095_v54  ;;  %s1221_s6 = sshll.u32 %s188_s5, 4  ;;  %s1884_s6 = int_to_ptr.vmem [resolvable:$true] %s1221_s6 }
  0x1d   : > { %v206_v4 = vpack.c.bf16 %v203_v2, %v203_v2  ;;  %v530_v5 = vsel %vm528_vm0, %v205_v3, 0  ;;  %s1475_s15 = scalar_lea.vmem %s1884_s6, 64  ;;  %p1482_p1 = scmp.lt.s32.totalorder %s1884_s6, %s1480_s18 }
  0x1e   : > { %p1476_p12 = scmp.ne.s32.totalorder %s1884_s6, %s1475_s15  ;;  %p1483_p2 = scmp.lt.s32.totalorder %s1481_s19, %s1475_s15 }
  0x1f   : > { %1337 = vmatprep.subr.msk.bf16.mxu0 %vm528_vm0, %v206_v4  ;;  %1379 = vmatprep.subr.msk.bf16.mxu1 %vm528_vm0, %v206_v4 }
  0x20   : > { %536 = vmatpush1.bf16.msra.mxu0 %v530_v5  ;;  %1380 = vmatpush1.bf16.msra.mxu1 %v530_v5  ;;  %p1477_p13 = pnand %p1476_p12, %p1618_p4  ;;  %p1484_p3 = por %p1483_p2, %p1482_p1 }
  0x22   : > { %p1478_p0 = pneg %p1477_p13 }
  0x23   : > { %1338 = vmatmul.mubr.msk.bf16.vlgmr.msra.gmra.mrb[0].mxu0 %vm431_vm1, %v1443_v6  ;;  %1359 = vmatmul.mubr.msk.bf16.vlgmr.msra.gmra.mrb[0].mxu1 %vm431_vm1, %v1459_v7 }
  0x24   : > { %577 = vmatprep.mubr.bf16.mxu0 %v1555_v0  ;;  %787 = vmatprep.mubr.bf16.mxu1 %v1555_v0  ;;  %p1485_p5 = pnand %p1484_p3, %p1478_p0 }
  0x2b   : > { %1339 = vmatmul.mubr.msk.bf16.gmra.mrb[4].mxu0 %vm431_vm1, %v1444_v8  ;;  %1360 = vmatmul.mubr.msk.bf16.gmra.mrb[4].mxu1 %vm431_vm1, %v1461_v9 }
  0x2c   : > { %587 = vmatprep.mubr.bf16.mxu0 %v1555_v0  ;;  %797 = vmatprep.mubr.bf16.mxu1 %v1555_v0 }
  0x33   : > { %1340 = vmatmul.mubr.msk.bf16.gmra.mrb[8].mxu0 %vm431_vm1, %v1445_v10  ;;  %1361 = vmatmul.mubr.msk.bf16.gmra.mrb[8].mxu1 %vm431_vm1, %v1463_v11 }
  0x34   : > { %597 = vmatprep.mubr.bf16.mxu0 %v1555_v0  ;;  %807 = vmatprep.mubr.bf16.mxu1 %v1555_v0 }
  0x3b   : > { %1341 = vmatmul.mubr.msk.bf16.gmra.mrb[12].mxu0 %vm431_vm1, %v1446_v12  ;;  %1362 = vmatmul.mubr.msk.bf16.gmra.mrb[12].mxu1 %vm431_vm1, %v1465_v13 }
  0x3c   : > { %607 = vmatprep.mubr.bf16.mxu0 %v1555_v0  ;;  %817 = vmatprep.mubr.bf16.mxu1 %v1555_v0 }
  0x43   : > { %1342 = vmatmul.mubr.msk.bf16.gmra.mrb[16].mxu0 %vm431_vm1, %v1447_v14  ;;  %1363 = vmatmul.mubr.msk.bf16.gmra.mrb[16].mxu1 %vm431_vm1, %v1467_v15 }
  0x44   : > { %617 = vmatprep.mubr.bf16.mxu0 %v1555_v0  ;;  %827 = vmatprep.mubr.bf16.mxu1 %v1555_v0 }
  0x4b   : > { %1343 = vmatmul.mubr.msk.bf16.gmra.mrb[20].mxu0 %vm431_vm1, %v1448_v16  ;;  %1364 = vmatmul.mubr.msk.bf16.gmra.mrb[20].mxu1 %vm431_vm1, %v1469_v17 }
  0x4c   : > { %627 = vmatprep.mubr.bf16.mxu0 %v1555_v0  ;;  %837 = vmatprep.mubr.bf16.mxu1 %v1555_v0 }
  0x53   : > { %1344 = vmatmul.mubr.msk.bf16.gmra.mrb[24].mxu0 %vm431_vm1, %v1449_v18  ;;  %1365 = vmatmul.mubr.msk.bf16.gmra.mrb[24].mxu1 %vm431_vm1, %v1470_v19 }
  0x54   : > { %637 = vmatprep.mubr.bf16.mxu0 %v1555_v0  ;;  %847 = vmatprep.mubr.bf16.mxu1 %v1555_v0 }
  0x5b   : > { %1345 = vmatmul.mubr.msk.bf16.gmra.mrb[28].mxu0 %vm431_vm1, %v1450_v20  ;;  %1366 = vmatmul.mubr.msk.bf16.gmra.mrb[28].mxu1 %vm431_vm1, %v1471_v21 }
  0x5c   : > { %647 = vmatprep.mubr.bf16.mxu0 %v1555_v0  ;;  %857 = vmatprep.mubr.bf16.mxu1 %v1555_v0 }
  0x63   : > { %1346 = vmatmul.mubr.msk.bf16.gmra.mrb[32].mxu0 %vm431_vm1, %v1451_v22  ;;  %1367 = vmatmul.mubr.msk.bf16.gmra.mrb[32].mxu1 %vm431_vm1, %v1472_v23 }
  0x64   : > { %657 = vmatprep.mubr.bf16.mxu0 %v1555_v0  ;;  %867 = vmatprep.mubr.bf16.mxu1 %v1555_v0 }
  0x6b   : > { %1347 = vmatmul.mubr.msk.bf16.gmra.mrb[36].mxu0 %vm431_vm1, %v1452_v24  ;;  %1368 = vmatmul.mubr.msk.bf16.gmra.mrb[36].mxu1 %vm431_vm1, %v1473_v25 }
  0x6c   : > { %667 = vmatprep.mubr.bf16.mxu0 %v1555_v0  ;;  %877 = vmatprep.mubr.bf16.mxu1 %v1555_v0 }
  0x73   : > { %1348 = vmatmul.mubr.msk.bf16.gmra.mrb[40].mxu0 %vm431_vm1, %v1453_v26  ;;  %1369 = vmatmul.mubr.msk.bf16.gmra.mrb[40].mxu1 %vm431_vm1, %v1474_v27 }
  0x74   : > { %677 = vmatprep.mubr.bf16.mxu0 %v1555_v0  ;;  %1142 = vmatprep.mubr.bf16.mxu1 %v1801_v61 }
  0x7b   : > { %1349 = vmatmul.mubr.msk.bf16.gmra.mrb[44].mxu0 %vm431_vm1, %v1454_v28 }
  0x7c   : > { %687 = vmatprep.mubr.bf16.mxu0 %v1555_v0 }
  0x83   : > { %1350 = vmatmul.mubr.msk.bf16.gmra.mrb[48].mxu0 %vm431_vm1, %v1455_v29 }
  0x84   : > { %697 = vmatprep.mubr.bf16.mxu0 %v1555_v0 }
  0x8b   : > { %1351 = vmatmul.mubr.msk.bf16.gmra.mrb[52].mxu0 %vm431_vm1, %v1456_v30 }
  0x8c   : > { %707 = vmatprep.mubr.bf16.mxu0 %v1555_v0 }
  0x93   : > { %1352 = vmatmul.mubr.msk.bf16.gmra.mrb[56].mxu0 %vm431_vm1, %v1457_v31 }
  0x94   : > { %717 = vmatprep.mubr.bf16.mxu0 %v1555_v0 }
  0x9b   : > { %1353 = vmatmul.mubr.msk.bf16.gmra.mrb[60].mxu0 %vm431_vm1, %v1458_v32 }
  0x9c   : > { %727 = vmatprep.mubr.bf16.mxu0 %v1555_v0 }
  0xa3   : > { %1354 = vmatmul.mubr.msk.bf16.gmra.mrb[64].mxu0 %vm431_vm1, %v1460_v33 }
  0xa4   : > { %737 = vmatprep.mubr.bf16.mxu0 %v1555_v0 }
  0xab   : > { %1355 = vmatmul.mubr.msk.bf16.gmra.mrb[68].mxu0 %vm431_vm1, %v1462_v34 }
  0xac   : > { %747 = vmatprep.mubr.bf16.mxu0 %v1555_v0 }
  0xb3   : > { %1356 = vmatmul.mubr.msk.bf16.gmra.mrb[72].mxu0 %vm431_vm1, %v1464_v35 }
  0xb4   : > { %757 = vmatprep.mubr.bf16.mxu0 %v1555_v0 }
  0xbb   : > { %1357 = vmatmul.mubr.msk.bf16.gmra.mrb[76].mxu0 %vm431_vm1, %v1466_v36 }
  0xbc   : > { %767 = vmatprep.mubr.bf16.mxu0 %v1555_v0  ;;  %v1803_v0 = vrot.slane %v1370_v49, %v1095_v54 }
  0xc3   : > { %1358 = vmatmul.mubr.msk.bf16.gmra.mrb[80].mxu0 %vm431_vm1, %v1468_v37 }
  0xf6   : > { %v569_v38 = vpop.f32.mrb[0].mxu0  ;;  %v779_v52 = vpop.f32.mrb[0].mxu1 }
  0xf7   : > { %v571_v42 = vpop.f32.mrb[1].mxu0  ;;  %v888_v43 = vmax.f32 %v569_v38, 0.0  ;;  %v972_v56 = vmax.f32 %v779_v52, 0.0  ;;  %v781_v57 = vpop.f32.mrb[1].mxu1 }
  0xf8   : > { %v573_v44 = vpop.f32.mrb[2].mxu0  ;;  %v889_v50 = vmax.f32 %v571_v42, 0.0  ;;  %v973_v59 = vmax.f32 %v781_v57, 0.0  ;;  %v783_v60 = vpop.f32.mrb[2].mxu1 }
  0xf9   : > { %v890_v47 = vmax.f32 %v573_v44, 0.0  ;;  %v575_v48 = vpop.f32.mrb[3].mxu0  ;;  %v974_v62 = vmax.f32 %v783_v60, 0.0  ;;  %v785_v63 = vpop.f32.mrb[3].mxu1 }
  0xfa   : > { %v891_v51 = vmax.f32 %v575_v48, 0.0  ;;  %v975_v2 = vmax.f32 %v785_v63, 0.0 }
  0xfb   : > { %v1016_v55 = vpack.c.bf16 %v890_v47, %v888_v43  ;;  %v1806_v4 = vpack.c.bf16 %v974_v62, %v972_v56 }
  0xfc   : > { %v1017_v58 = vpack.c.bf16 %v891_v51, %v889_v50  ;;  %v1808_v6 = vpack.c.bf16 %v975_v2, %v973_v59 }
  0xfe   : > { %v579_v1 = vpop.f32.mrb[4].mxu0  ;;  %1110 = vmatprep.subr.bf16.mxu1 %v1017_v58  ;;  %v789_v12 = vpop.f32.mrb[4].mxu1 }
  0xff   : > { %v581_v3 = vpop.f32.mrb[5].mxu0  ;;  %1111 = vmatpush1.bf16.msra.mxu1 %v1016_v55  ;;  %v892_v7 = vmax.f32 %v579_v1, 0.0  ;;  %v976_v14 = vmax.f32 %v789_v12, 0.0  ;;  %v791_v15 = vpop.f32.mrb[5].mxu1 }
 0x100   : > { %v583_v5 = vpop.f32.mrb[6].mxu0  ;;  %v893_v10 = vmax.f32 %v581_v3, 0.0  ;;  %v977_v17 = vmax.f32 %v791_v15, 0.0  ;;  %v793_v18 = vpop.f32.mrb[6].mxu1 }
 0x101   : > { %v894_v8 = vmax.f32 %v583_v5, 0.0  ;;  %v585_v9 = vpop.f32.mrb[7].mxu0  ;;  %v978_v19 = vmax.f32 %v793_v18, 0.0  ;;  %v795_v20 = vpop.f32.mrb[7].mxu1 }
 0x102   : > { %v895_v11 = vmax.f32 %v585_v9, 0.0  ;;  %v979_v22 = vmax.f32 %v795_v20, 0.0 }
 0x103   : > { %v1018_v13 = vpack.c.bf16 %v894_v8, %v892_v7  ;;  %v1810_v24 = vpack.c.bf16 %v978_v19, %v976_v14 }
 0x104   : > { %v1019_v16 = vpack.c.bf16 %v895_v11, %v893_v10  ;;  %v1812_v26 = vpack.c.bf16 %v979_v22, %v977_v17 }
 0x106   : > { %v589_v21 = vpop.f32.mrb[8].mxu0  ;;  %1112 = vmatprep.subr.bf16.mxu1 %v1019_v16  ;;  %v799_v32 = vpop.f32.mrb[8].mxu1 }
 0x107   : > { %v591_v23 = vpop.f32.mrb[9].mxu0  ;;  %1113 = vmatpush1.bf16.msra.mxu1 %v1018_v13  ;;  %v896_v27 = vmax.f32 %v589_v21, 0.0  ;;  %v980_v34 = vmax.f32 %v799_v32, 0.0  ;;  %v801_v35 = vpop.f32.mrb[9].mxu1 }
 0x108   : > { %v593_v25 = vpop.f32.mrb[10].mxu0  ;;  %v897_v30 = vmax.f32 %v591_v23, 0.0  ;;  %v981_v37 = vmax.f32 %v801_v35, 0.0  ;;  %v803_v38 = vpop.f32.mrb[10].mxu1 }
 0x109   : > { %v898_v28 = vmax.f32 %v593_v25, 0.0  ;;  %v595_v29 = vpop.f32.mrb[11].mxu0  ;;  %v982_v39 = vmax.f32 %v803_v38, 0.0  ;;  %v805_v40 = vpop.f32.mrb[11].mxu1 }
 0x10a   : > { %v899_v31 = vmax.f32 %v595_v29, 0.0  ;;  %v983_v42 = vmax.f32 %v805_v40, 0.0 }
 0x10b   : > { %v1020_v33 = vpack.c.bf16 %v898_v28, %v896_v27  ;;  %v1814_v44 = vpack.c.bf16 %v982_v39, %v980_v34 }
 0x10c   : > { %v1021_v36 = vpack.c.bf16 %v899_v31, %v897_v30  ;;  %v1816_v46 = vpack.c.bf16 %v983_v42, %v981_v37 }
 0x10e   : > { %v599_v41 = vpop.f32.mrb[12].mxu0  ;;  %1114 = vmatprep.subr.bf16.mxu1 %v1021_v36  ;;  %v809_v52 = vpop.f32.mrb[12].mxu1 }
 0x10f   : > { %v601_v43 = vpop.f32.mrb[13].mxu0  ;;  %1115 = vmatpush1.bf16.msra.mxu1 %v1020_v33  ;;  %v900_v47 = vmax.f32 %v599_v41, 0.0  ;;  %v984_v54 = vmax.f32 %v809_v52, 0.0  ;;  %v811_v55 = vpop.f32.mrb[13].mxu1 }
 0x110   : > { %v603_v45 = vpop.f32.mrb[14].mxu0  ;;  %v901_v50 = vmax.f32 %v601_v43, 0.0  ;;  %v985_v57 = vmax.f32 %v811_v55, 0.0  ;;  %v813_v58 = vpop.f32.mrb[14].mxu1 }
 0x111   : > { %v902_v48 = vmax.f32 %v603_v45, 0.0  ;;  %v605_v49 = vpop.f32.mrb[15].mxu0  ;;  %v986_v59 = vmax.f32 %v813_v58, 0.0  ;;  %v815_v60 = vpop.f32.mrb[15].mxu1 }
 0x112   : > { %v903_v51 = vmax.f32 %v605_v49, 0.0  ;;  %v987_v63 = vmax.f32 %v815_v60, 0.0 }
 0x113   : > { %v1022_v53 = vpack.c.bf16 %v902_v48, %v900_v47  ;;  %v1818_v2 = vpack.c.bf16 %v986_v59, %v984_v54 }
 0x114   : > { %v1023_v56 = vpack.c.bf16 %v903_v51, %v901_v50  ;;  %v1820_v5 = vpack.c.bf16 %v987_v63, %v985_v57 }
 0x116   : > { %v609_v62 = vpop.f32.mrb[16].mxu0  ;;  %1116 = vmatprep.subr.bf16.mxu1 %v1023_v56  ;;  %v819_v12 = vpop.f32.mrb[16].mxu1 }
 0x117   : > { %v611_v1 = vpop.f32.mrb[17].mxu0  ;;  %1117 = vmatpush1.bf16.msra.mxu1 %v1022_v53  ;;  %v904_v7 = vmax.f32 %v609_v62, 0.0  ;;  %v988_v14 = vmax.f32 %v819_v12, 0.0  ;;  %v821_v15 = vpop.f32.mrb[17].mxu1 }
 0x118   : > { %v613_v3 = vpop.f32.mrb[18].mxu0  ;;  %v905_v10 = vmax.f32 %v611_v1, 0.0  ;;  %v989_v17 = vmax.f32 %v821_v15, 0.0  ;;  %v823_v18 = vpop.f32.mrb[18].mxu1 }
 0x119   : > { %v906_v8 = vmax.f32 %v613_v3, 0.0  ;;  %v615_v9 = vpop.f32.mrb[19].mxu0  ;;  %v990_v19 = vmax.f32 %v823_v18, 0.0  ;;  %v825_v20 = vpop.f32.mrb[19].mxu1 }
 0x11a   : > { %v907_v11 = vmax.f32 %v615_v9, 0.0  ;;  %v991_v22 = vmax.f32 %v825_v20, 0.0 }
 0x11b   : > { %v1024_v13 = vpack.c.bf16 %v906_v8, %v904_v7  ;;  %v1822_v25 = vpack.c.bf16 %v990_v19, %v988_v14 }
 0x11c   : > { %v1025_v16 = vpack.c.bf16 %v907_v11, %v905_v10  ;;  %v1824_v28 = vpack.c.bf16 %v991_v22, %v989_v17 }
 0x11e   : > { %v619_v21 = vpop.f32.mrb[20].mxu0  ;;  %1118 = vmatprep.subr.bf16.mxu1 %v1025_v16  ;;  %v829_v34 = vpop.f32.mrb[20].mxu1 }
 0x11f   : > { %v621_v23 = vpop.f32.mrb[21].mxu0  ;;  %1119 = vmatpush1.bf16.msra.mxu1 %v1024_v13  ;;  %v908_v29 = vmax.f32 %v619_v21, 0.0  ;;  %v992_v36 = vmax.f32 %v829_v34, 0.0  ;;  %v831_v37 = vpop.f32.mrb[21].mxu1 }
 0x120   : > { %v623_v27 = vpop.f32.mrb[22].mxu0  ;;  %v909_v32 = vmax.f32 %v621_v23, 0.0  ;;  %v993_v39 = vmax.f32 %v831_v37, 0.0  ;;  %v833_v40 = vpop.f32.mrb[22].mxu1 }
 0x121   : > { %v910_v30 = vmax.f32 %v623_v27, 0.0  ;;  %v625_v31 = vpop.f32.mrb[23].mxu0  ;;  %v994_v41 = vmax.f32 %v833_v40, 0.0  ;;  %v835_v42 = vpop.f32.mrb[23].mxu1 }
 0x122   : > { %v911_v33 = vmax.f32 %v625_v31, 0.0  ;;  %v995_v45 = vmax.f32 %v835_v42, 0.0 }
 0x123   : > { %v1026_v35 = vpack.c.bf16 %v910_v30, %v908_v29  ;;  %v1826_v48 = vpack.c.bf16 %v994_v41, %v992_v36 }
 0x124   : > { %v1027_v38 = vpack.c.bf16 %v911_v33, %v909_v32  ;;  %v1828_v50 = vpack.c.bf16 %v995_v45, %v993_v39 }
 0x126   : > { %v629_v43 = vpop.f32.mrb[24].mxu0  ;;  %1120 = vmatprep.subr.bf16.mxu1 %v1027_v38  ;;  %v839_v56 = vpop.f32.mrb[24].mxu1 }
 0x127   : > { %v631_v47 = vpop.f32.mrb[25].mxu0  ;;  %1121 = vmatpush1.bf16.msra.mxu1 %v1026_v35  ;;  %v912_v51 = vmax.f32 %v629_v43, 0.0  ;;  %v996_v58 = vmax.f32 %v839_v56, 0.0  ;;  %v841_v59 = vpop.f32.mrb[25].mxu1 }
 0x128   : > { %v633_v49 = vpop.f32.mrb[26].mxu0  ;;  %v913_v54 = vmax.f32 %v631_v47, 0.0  ;;  %v997_v62 = vmax.f32 %v841_v59, 0.0  ;;  %v843_v63 = vpop.f32.mrb[26].mxu1 }
 0x129   : > { %v914_v52 = vmax.f32 %v633_v49, 0.0  ;;  %v635_v53 = vpop.f32.mrb[27].mxu0  ;;  %v998_v1 = vmax.f32 %v843_v63, 0.0  ;;  %v845_v3 = vpop.f32.mrb[27].mxu1 }
 0x12a   : > { %v915_v55 = vmax.f32 %v635_v53, 0.0  ;;  %v999_v8 = vmax.f32 %v845_v3, 0.0 }
 0x12b   : > { %v1028_v57 = vpack.c.bf16 %v914_v52, %v912_v51  ;;  %v1830_v10 = vpack.c.bf16 %v998_v1, %v996_v58 }
 0x12c   : > { %v1029_v60 = vpack.c.bf16 %v915_v55, %v913_v54  ;;  %v1832_v12 = vpack.c.bf16 %v999_v8, %v997_v62 }
 0x12e   : > { %v639_v7 = vpop.f32.mrb[28].mxu0  ;;  %1122 = vmatprep.subr.bf16.mxu1 %v1029_v60  ;;  %v849_v18 = vpop.f32.mrb[28].mxu1 }
 0x12f   : > { %v641_v9 = vpop.f32.mrb[29].mxu0  ;;  %1123 = vmatpush1.bf16.msra.mxu1 %v1028_v57  ;;  %v916_v13 = vmax.f32 %v639_v7, 0.0  ;;  %v1000_v20 = vmax.f32 %v849_v18, 0.0  ;;  %v851_v21 = vpop.f32.mrb[29].mxu1 }
 0x130   : > { %v643_v11 = vpop.f32.mrb[30].mxu0  ;;  %v917_v16 = vmax.f32 %v641_v9, 0.0  ;;  %v1001_v23 = vmax.f32 %v851_v21, 0.0  ;;  %v853_v27 = vpop.f32.mrb[30].mxu1 }
 0x131   : > { %v918_v14 = vmax.f32 %v643_v11, 0.0  ;;  %v645_v15 = vpop.f32.mrb[31].mxu0  ;;  %v1002_v29 = vmax.f32 %v853_v27, 0.0  ;;  %v855_v30 = vpop.f32.mrb[31].mxu1 }
 0x132   : > { %v919_v17 = vmax.f32 %v645_v15, 0.0  ;;  %v1003_v32 = vmax.f32 %v855_v30, 0.0 }
 0x133   : > { %v1030_v19 = vpack.c.bf16 %v918_v14, %v916_v13  ;;  %v1834_v34 = vpack.c.bf16 %v1002_v29, %v1000_v20 }
 0x134   : > { %v1031_v22 = vpack.c.bf16 %v919_v17, %v917_v16  ;;  %v1836_v36 = vpack.c.bf16 %v1003_v32, %v1001_v23 }
 0x136   : > { %v649_v31 = vpop.f32.mrb[32].mxu0  ;;  %1124 = vmatprep.subr.bf16.mxu1 %v1031_v22  ;;  %v859_v42 = vpop.f32.mrb[32].mxu1 }
 0x137   : > { %v651_v33 = vpop.f32.mrb[33].mxu0  ;;  %1125 = vmatpush1.bf16.msra.mxu1 %v1030_v19  ;;  %v920_v37 = vmax.f32 %v649_v31, 0.0  ;;  %v1004_v45 = vmax.f32 %v859_v42, 0.0  ;;  %v861_v47 = vpop.f32.mrb[33].mxu1 }
 0x138   : > { %v653_v35 = vpop.f32.mrb[34].mxu0  ;;  %v921_v40 = vmax.f32 %v651_v33, 0.0  ;;  %v1005_v51 = vmax.f32 %v861_v47, 0.0  ;;  %v863_v52 = vpop.f32.mrb[34].mxu1 }
 0x139   : > { %v922_v38 = vmax.f32 %v653_v35, 0.0  ;;  %v655_v39 = vpop.f32.mrb[35].mxu0  ;;  %v1006_v53 = vmax.f32 %v863_v52, 0.0  ;;  %v865_v54 = vpop.f32.mrb[35].mxu1 }
 0x13a   : > { %v923_v41 = vmax.f32 %v655_v39, 0.0  ;;  %v1007_v56 = vmax.f32 %v865_v54, 0.0 }
 0x13b   : > { %v1032_v43 = vpack.c.bf16 %v922_v38, %v920_v37  ;;  %v1838_v58 = vpack.c.bf16 %v1006_v53, %v1004_v45 }
 0x13c   : > { %v1033_v49 = vpack.c.bf16 %v923_v41, %v921_v40  ;;  %v1840_v60 = vpack.c.bf16 %v1007_v56, %v1005_v51 }
 0x13e   : > { %v659_v55 = vpop.f32.mrb[36].mxu0  ;;  %1126 = vmatprep.subr.bf16.mxu1 %v1033_v49  ;;  %v869_v8 = vpop.f32.mrb[36].mxu1 }
 0x13f   : > { %v661_v57 = vpop.f32.mrb[37].mxu0  ;;  %1127 = vmatpush1.bf16.msra.mxu1 %v1032_v43  ;;  %v924_v62 = vmax.f32 %v659_v55, 0.0  ;;  %v1008_v11 = vmax.f32 %v869_v8, 0.0  ;;  %v871_v13 = vpop.f32.mrb[37].mxu1 }
 0x140   : > { %v663_v59 = vpop.f32.mrb[38].mxu0  ;;  %v925_v3 = vmax.f32 %v661_v57, 0.0  ;;  %v1009_v15 = vmax.f32 %v871_v13, 0.0  ;;  %v873_v16 = vpop.f32.mrb[38].mxu1 }
 0x141   : > { %v926_v63 = vmax.f32 %v663_v59, 0.0  ;;  %v665_v1 = vpop.f32.mrb[39].mxu0  ;;  %v1010_v17 = vmax.f32 %v873_v16, 0.0  ;;  %v875_v18 = vpop.f32.mrb[39].mxu1 }
 0x142   : > { %v927_v7 = vmax.f32 %v665_v1, 0.0  ;;  %v1011_v20 = vmax.f32 %v875_v18, 0.0 }
 0x143   : > { %v1034_v9 = vpack.c.bf16 %v926_v63, %v924_v62  ;;  %v1842_v22 = vpack.c.bf16 %v1010_v17, %v1008_v11 }
 0x144   : > { %v1035_v14 = vpack.c.bf16 %v927_v7, %v925_v3  ;;  %v1844_v27 = vpack.c.bf16 %v1011_v20, %v1009_v15 }
 0x146   : > { %v669_v19 = vpop.f32.mrb[40].mxu0  ;;  %1128 = vmatprep.subr.bf16.mxu1 %v1035_v14  ;;  %v879_v35 = vpop.f32.mrb[40].mxu1 }
 0x147   : > { %v671_v21 = vpop.f32.mrb[41].mxu0  ;;  %1129 = vmatpush1.bf16.msra.mxu1 %v1034_v9  ;;  %v928_v29 = vmax.f32 %v669_v19, 0.0  ;;  %v1012_v38 = vmax.f32 %v879_v35, 0.0  ;;  %v881_v39 = vpop.f32.mrb[41].mxu1 }
 0x148   : > { %v673_v23 = vpop.f32.mrb[42].mxu0  ;;  %v929_v32 = vmax.f32 %v671_v21, 0.0  ;;  %v1013_v41 = vmax.f32 %v881_v39, 0.0  ;;  %v883_v42 = vpop.f32.mrb[42].mxu1 }
 0x149   : > { %v930_v30 = vmax.f32 %v673_v23, 0.0  ;;  %v675_v31 = vpop.f32.mrb[43].mxu0  ;;  %v1014_v43 = vmax.f32 %v883_v42, 0.0  ;;  %v885_v45 = vpop.f32.mrb[43].mxu1 }
 0x14a   : > { %v931_v33 = vmax.f32 %v675_v31, 0.0  ;;  %v1015_v49 = vmax.f32 %v885_v45, 0.0 }
 0x14b   : > { %v1036_v37 = vpack.c.bf16 %v930_v30, %v928_v29  ;;  %v1846_v52 = vpack.c.bf16 %v1014_v43, %v1012_v38 }
 0x14c   : > { %v1037_v40 = vpack.c.bf16 %v931_v33, %v929_v32  ;;  %v1848_v54 = vpack.c.bf16 %v1015_v49, %v1013_v41 }
 0x14e   : > { %v679_v47 = vpop.f32.mrb[44].mxu0  ;;  %1130 = vmatprep.subr.bf16.mxu1 %v1037_v40 }
 0x14f   : > { %v681_v51 = vpop.f32.mrb[45].mxu0  ;;  %1131 = vmatpush1.bf16.msra.mxu1 %v1036_v37  ;;  %v932_v55 = vmax.f32 %v679_v47, 0.0 }
 0x150   : > { %v683_v53 = vpop.f32.mrb[46].mxu0  ;;  %v933_v59 = vmax.f32 %v681_v51, 0.0 }
 0x151   : > { %v934_v56 = vmax.f32 %v683_v53, 0.0  ;;  %v685_v57 = vpop.f32.mrb[47].mxu0 }
 0x152   : > { %v935_v62 = vmax.f32 %v685_v57, 0.0 }
 0x153   : > { %v1038_v63 = vpack.c.bf16 %v934_v56, %v932_v55 }
 0x154   : > { %v1039_v1 = vpack.c.bf16 %v935_v62, %v933_v59 }
 0x156   : > { %v689_v3 = vpop.f32.mrb[48].mxu0  ;;  %1132 = vmatprep.subr.bf16.mxu1 %v1039_v1 }
 0x157   : > { %v691_v7 = vpop.f32.mrb[49].mxu0  ;;  %1133 = vmatpush1.bf16.msra.mxu1 %v1038_v63  ;;  %v936_v9 = vmax.f32 %v689_v3, 0.0 }
 0x158   : > { %v693_v8 = vpop.f32.mrb[50].mxu0  ;;  %v937_v14 = vmax.f32 %v691_v7, 0.0 }
 0x159   : > { %v938_v11 = vmax.f32 %v693_v8, 0.0  ;;  %v695_v13 = vpop.f32.mrb[51].mxu0  ;;  %v1105_v8 = vcombine.high %v1801_v61, %v1801_v61 }
 0x15a   : > { %v939_v15 = vmax.f32 %v695_v13, 0.0 }
 0x15b   : > { %v1040_v16 = vpack.c.bf16 %v938_v11, %v936_v9 }
 0x15c   : > { %v1041_v17 = vpack.c.bf16 %v939_v15, %v937_v14 }
 0x15e   : > { %v699_v18 = vpop.f32.mrb[52].mxu0  ;;  %1134 = vmatprep.subr.bf16.mxu1 %v1041_v17 }
 0x15f   : > { %v701_v19 = vpop.f32.mrb[53].mxu0  ;;  %1135 = vmatpush1.bf16.msra.mxu1 %v1040_v16  ;;  %v940_v21 = vmax.f32 %v699_v18, 0.0 }
 0x160   : > { %v703_v20 = vpop.f32.mrb[54].mxu0  ;;  %v941_v30 = vmax.f32 %v701_v19, 0.0 }
 0x161   : > { %v942_v23 = vmax.f32 %v703_v20, 0.0  ;;  %v705_v29 = vpop.f32.mrb[55].mxu0 }
 0x162   : > { %v943_v31 = vmax.f32 %v705_v29, 0.0 }
 0x163   : > { %v1042_v32 = vpack.c.bf16 %v942_v23, %v940_v21 }
 0x164   : > { %v1043_v33 = vpack.c.bf16 %v943_v31, %v941_v30 }
 0x166   : > { %v709_v35 = vpop.f32.mrb[56].mxu0  ;;  %1136 = vmatprep.subr.bf16.mxu1 %v1043_v33 }
 0x167   : > { %v711_v37 = vpop.f32.mrb[57].mxu0  ;;  %1137 = vmatpush1.bf16.msra.mxu1 %v1042_v32  ;;  %v944_v39 = vmax.f32 %v709_v35, 0.0 }
 0x168   : > { %v713_v38 = vpop.f32.mrb[58].mxu0  ;;  %v945_v42 = vmax.f32 %v711_v37, 0.0 }
 0x169   : > { %v946_v40 = vmax.f32 %v713_v38, 0.0  ;;  %v715_v41 = vpop.f32.mrb[59].mxu0 }
 0x16a   : > { %v947_v43 = vmax.f32 %v715_v41, 0.0 }
 0x16b   : > { %v1044_v45 = vpack.c.bf16 %v946_v40, %v944_v39 }
 0x16c   : > { %v1045_v47 = vpack.c.bf16 %v947_v43, %v945_v42 }
 0x16e   : > { %v719_v49 = vpop.f32.mrb[60].mxu0  ;;  %1138 = vmatprep.subr.bf16.mxu1 %v1045_v47 }
 0x16f   : > { %v721_v51 = vpop.f32.mrb[61].mxu0  ;;  %1139 = vmatpush1.bf16.msra.mxu1 %v1044_v45  ;;  %v948_v55 = vmax.f32 %v719_v49, 0.0 }
 0x170   : > { %v723_v53 = vpop.f32.mrb[62].mxu0  ;;  %v949_v59 = vmax.f32 %v721_v51, 0.0 }
 0x171   : > { %v950_v56 = vmax.f32 %v723_v53, 0.0  ;;  %v725_v57 = vpop.f32.mrb[63].mxu0 }
 0x172   : > { %v951_v62 = vmax.f32 %v725_v57, 0.0 }
 0x173   : > { %v1046_v63 = vpack.c.bf16 %v950_v56, %v948_v55 }
 0x174   : > { %v1047_v1 = vpack.c.bf16 %v951_v62, %v949_v59 }
 0x176   : > { %v729_v3 = vpop.f32.mrb[64].mxu0  ;;  %1140 = vmatprep.subr.bf16.mxu1 %v1047_v1 }
 0x177   : > { %v731_v7 = vpop.f32.mrb[65].mxu0  ;;  %1141 = vmatpush1.bf16.msra.mxu1 %v1046_v63  ;;  %v952_v11 = vmax.f32 %v729_v3, 0.0 }
 0x178   : > { %v733_v9 = vpop.f32.mrb[66].mxu0  ;;  %v953_v15 = vmax.f32 %v731_v7, 0.0 }
 0x179   : > { %v954_v13 = vmax.f32 %v733_v9, 0.0  ;;  %v735_v14 = vpop.f32.mrb[67].mxu0 }
 0x17a   : > { %v955_v16 = vmax.f32 %v735_v14, 0.0  ;;  %1143 = vmatmul.mubr.bf16.vlgmr.msra.gmra.mrb[44].mxu1 %v1803_v0 }
 0x17b   : > { %v1048_v17 = vpack.c.bf16 %v954_v13, %v952_v11  ;;  %1183 = vmatprep.mubr.bf16.mxu1 %v1105_v8 }
 0x17c   : > { %v1049_v18 = vpack.c.bf16 %v955_v16, %v953_v15 }
 0x17e   : > { %v739_v19 = vpop.f32.mrb[68].mxu0  ;;  %1151 = vmatprep.subr.bf16.mxu1 %v1049_v18 }
 0x17f   : > { %v741_v20 = vpop.f32.mrb[69].mxu0  ;;  %1152 = vmatpush1.bf16.msra.mxu1 %v1048_v17  ;;  %v956_v23 = vmax.f32 %v739_v19, 0.0 }
 0x180   : > { %v743_v21 = vpop.f32.mrb[70].mxu0  ;;  %v957_v61 = vmax.f32 %v741_v20, 0.0 }
 0x181   : > { %v958_v29 = vmax.f32 %v743_v21, 0.0  ;;  %v745_v30 = vpop.f32.mrb[71].mxu0 }
 0x182   : > { %v959_v31 = vmax.f32 %v745_v30, 0.0 }
 0x183   : > { %v1050_v32 = vpack.c.bf16 %v958_v29, %v956_v23 }
 0x184   : > { %v1051_v33 = vpack.c.bf16 %v959_v31, %v957_v61 }
 0x186   : > { %v749_v35 = vpop.f32.mrb[72].mxu0  ;;  %1153 = vmatprep.subr.bf16.mxu1 %v1051_v33 }
 0x187   : > { %v751_v37 = vpop.f32.mrb[73].mxu0  ;;  %1154 = vmatpush1.bf16.msra.mxu1 %v1050_v32  ;;  %v960_v39 = vmax.f32 %v749_v35, 0.0 }
 0x188   : > { %v753_v38 = vpop.f32.mrb[74].mxu0  ;;  %v961_v42 = vmax.f32 %v751_v37, 0.0 }
 0x189   : > { %v962_v40 = vmax.f32 %v753_v38, 0.0  ;;  %v755_v41 = vpop.f32.mrb[75].mxu0 }
 0x18a   : > { %v963_v43 = vmax.f32 %v755_v41, 0.0 }
 0x18b   : > { %v1052_v45 = vpack.c.bf16 %v962_v40, %v960_v39 }
 0x18c   : > { %v1053_v47 = vpack.c.bf16 %v963_v43, %v961_v42 }
 0x18e   : > { %v759_v49 = vpop.f32.mrb[76].mxu0  ;;  %1155 = vmatprep.subr.bf16.mxu1 %v1053_v47 }
 0x18f   : > { %v761_v51 = vpop.f32.mrb[77].mxu0  ;;  %1156 = vmatpush1.bf16.msra.mxu1 %v1052_v45  ;;  %v964_v55 = vmax.f32 %v759_v49, 0.0 }
 0x190   : > { %v763_v53 = vpop.f32.mrb[78].mxu0  ;;  %v965_v59 = vmax.f32 %v761_v51, 0.0 }
 0x191   : > { %v966_v56 = vmax.f32 %v763_v53, 0.0  ;;  %v765_v57 = vpop.f32.mrb[79].mxu0 }
 0x192   : > { %v967_v62 = vmax.f32 %v765_v57, 0.0 }
 0x193   : > { %v1054_v63 = vpack.c.bf16 %v966_v56, %v964_v55 }
 0x194   : > { %v1055_v1 = vpack.c.bf16 %v967_v62, %v965_v59 }
 0x196   : > { %v769_v3 = vpop.f32.mrb[80].mxu0  ;;  %1157 = vmatprep.subr.bf16.mxu1 %v1055_v1 }
 0x197   : > { %v771_v7 = vpop.f32.mrb[81].mxu0  ;;  %1158 = vmatpush1.bf16.msra.mxu1 %v1054_v63  ;;  %v968_v9 = vmax.f32 %v769_v3, 0.0 }
 0x198   : > { %v773_v8 = vpop.f32.mrb[82].mxu0  ;;  %v969_v14 = vmax.f32 %v771_v7, 0.0 }
 0x199   : > { %v970_v11 = vmax.f32 %v773_v8, 0.0  ;;  %v775_v13 = vpop.f32.mrb[83].mxu0 }
 0x19a   : > { %v971_v15 = vmax.f32 %v775_v13, 0.0 }
 0x19b   : > { %v1056_v16 = vpack.c.bf16 %v970_v11, %v968_v9 }
 0x19c   : > { %v1057_v17 = vpack.c.bf16 %v971_v15, %v969_v14 }
 0x19e   : > { %1159 = vmatprep.subr.bf16.mxu1 %v1057_v17 }
 0x19f   : > { %1160 = vmatpush1.bf16.msra.mxu1 %v1056_v16 }
 0x1a0   : > { %1161 = vmatprep.subr.bf16.mxu1 %v1808_v6 }
 0x1a3   : > { %1162 = vmatpush1.bf16.msra.mxu1 %v1806_v4  ;;  %v1104_v4 = vcombine.high %v1803_v0, %v1803_v0 }
 0x1a4   : > { %1163 = vmatprep.subr.bf16.mxu1 %v1812_v26 }
 0x1a7   : > { %1164 = vmatpush1.bf16.msra.mxu1 %v1810_v24 }
 0x1a8   : > { %1165 = vmatprep.subr.bf16.mxu1 %v1816_v46 }
 0x1ab   : > { %1166 = vmatpush1.bf16.msra.mxu1 %v1814_v44 }
 0x1ac   : > { %1167 = vmatprep.subr.bf16.mxu1 %v1820_v5 }
 0x1af   : > { %1168 = vmatpush1.bf16.msra.mxu1 %v1818_v2 }
 0x1b0   : > { %1169 = vmatprep.subr.bf16.mxu1 %v1824_v28 }
 0x1b3   : > { %1170 = vmatpush1.bf16.msra.mxu1 %v1822_v25 }
 0x1b4   : > { %1171 = vmatprep.subr.bf16.mxu1 %v1828_v50 }
 0x1b7   : > { %1172 = vmatpush1.bf16.msra.mxu1 %v1826_v48 }
 0x1b8   : > { %1173 = vmatprep.subr.bf16.mxu1 %v1832_v12 }
 0x1bb   : > { %1174 = vmatpush1.bf16.msra.mxu1 %v1830_v10 }
 0x1bc   : > { %1175 = vmatprep.subr.bf16.mxu1 %v1836_v36 }
 0x1bf   : > { %1176 = vmatpush1.bf16.msra.mxu1 %v1834_v34 }
 0x1c0   : > { %1177 = vmatprep.subr.bf16.mxu1 %v1840_v60 }
 0x1c3   : > { %1178 = vmatpush1.bf16.msra.mxu1 %v1838_v58 }
 0x1c4   : > { %1179 = vmatprep.subr.bf16.mxu1 %v1844_v27 }
 0x1c7   : > { %1180 = vmatpush1.bf16.msra.mxu1 %v1842_v22 }
 0x1c8   : > { %1181 = vmatprep.subr.bf16.mxu1 %v1848_v54 }
 0x1cb   : > { %1182 = vmatpush1.bf16.msra.mxu1 %v1846_v52 }
 0x1ce   : > { %1184 = vmatmul.mubr.bf16.vlgmr.msra.gmra.mrb[44].mxu1 %v1104_v4 }
 0x2a1   : > { %v1185_v6 = vpop.f32.mrb[44].mxu1 }
 0x2a2   : > { %v1187_v24 = vpop.f32.mrb[45].mxu1 }
 0x2a3   : > { %v1194_v26 = vcombine.low %v1185_v6, %v1187_v24  ;;  %v1189_v44 = vpop.f32.mrb[46].mxu1 }
 0x2a4   : > { %v1190_v0 = vpop.f32.mrb[47].mxu1 }
 0x2a5   : > { %1371 = vst.sshfl [vmem:[%s188_s5] sm:$0x33 pattern:$0x76325410] %v1194_v26 }
 0x2a6   : > { %1488 = shalt.err (!%p1485_p5)
}
 0x2a7   : > { %s1489_s21 = scalar_lea.hbm %s1882_s9, 64  ;;  %s1493_s27 = scalar_lea.hbm %s1932_s3, 128 }
 0x2a8   : > { %p1490_p6 = scmp.ne.s32.totalorder %s1882_s9, %s1489_s21  ;;  %p1494_p10 = scmp.lt.u32.totalorder %s1882_s9, %s1932_s3 }
 0x2a9   : > { %p1495_p11 = scmp.lt.u32.totalorder %s1493_s27, %s1489_s21  ;;  %p1497_p13 = scmp.lt.u32.totalorder %s1489_s21, %s1882_s9 }
 0x2aa   : > { %p1491_p7 = pnand %p1490_p6, %p1618_p4 }
 0x2ab   : > { %p1496_p12 = por %p1495_p11, %p1494_p10 }
 0x2ac   : > { %p1492_p9 = pneg %p1491_p7 }
 0x2ad   : > { %p1498_p0 = por %p1497_p13, %p1496_p12 }
 0x2af   : > { %p1499_p1 = pnand %p1498_p0, %p1492_p9 }
 0x2b1   : > { %1502 = shalt.err (!%p1499_p1)
}
 0x2b2   : > { %1385 = dma.vmem_to_hbm [thread:$0]  (%p1618_p4), %s1884_s6, 64, %s1882_s9, %s1205_s10  }
 0x2b3 PF: > { %p1391_p2 = scmp.ge.s32.totalorder %s1553_s17, 2  ;;  %s1233_s30 = sand.u32 1, %s1533_s12  }
 0x2b4   : > { %s1234_s4 = scalar_lea.sflag [#allocation3], %s1233_s30 }
 0x2b5   : > { %p1388_p3 = pnand %p1391_p2, %p1625_p8 }
 0x2b7   : > { %1528 = dma.done.wait (!%p1388_p3), %s1234_s4, 64  }
 0x2b8   : > { %1530 = vsyncadd (!%p1388_p3), %s1234_s4, 4294967232  ;;  %s16_s17 = sadd.s32 1, %s1553_s17   ;;  %s1935_s12 = smov %s1537_s13 }
 0x2b9   : > { %p13_p5 = scmp.ge.s32.totalorder %s16_s17, 4   ;;  %s1936_s13 = smov %s1541_s14 }
 0x2ba   : > { %s1937_s14 = smov %s1631_s25  ;;  %s1938_s15 = smov %s1549_s16 }
 0x2bb   : > { %s1939_s16 = smov %s1941_s20  ;;  %15 = sbr.rel (!%p13_p5) target bundleno = 4 (0x4), region = 67 }
 0x2c2   :  { %1239 = vsyncpa [#allocation3], 1 }
 0x2c3   :  { %1241 = vsyncpa [#allocation3 + $0x1], 1 }

</bundles_post_ra>
